<compile_context>
chip_gen: v7x
topology: tpu7x:2x2x1
jax: 0.10.0
libtpu: 0.0.40
codegen_flags: <defaults>
</compile_context>

<pallas_src>
import functools

import jax
import jax.numpy as jnp
from jax import lax
from jax.experimental import pallas as pl
from jax.experimental.pallas import tpu as pltpu


# ---------------------------------------------------------------------------
# Pallas kernel: LSTM recurrence + VAE head, everything resident in VMEM.
# ---------------------------------------------------------------------------
def _vae_kernel(
    B, T,            # bound statically via functools.partial
    x_ref,           # (T*B, I)     time-major rows (row = t*B + b)
    wg_ref,          # (I, 4*HP)    padded W_ih^T; gate k lives in cols [k*HP, k*HP+Hr)
    ug_ref,          # (HP, 4*HP)   padded W_hh^T (rows >= Hr are zero)
    bg_ref,          # (1, 4*HP)    b_ih + b_hh folded, zero-padded
    w1_ref,          # (HP, HP)     padded fc1.weight^T
    b1_ref,          # (1, HP)
    w2_ref,          # (HP, 2*HP)   fused fc21 | fc22 (each in its own 128-lane block)
    b2_ref,          # (1, 2*HP)
    w3_ref,          # (HP, HP)     padded fc3.weight^T
    b3_ref,          # (1, HP)
    w4_ref,          # (HP, HP)     padded fc4.weight^T
    b4_ref,          # (1, HP)
    eps_ref,         # (T*B, HP)    zero-padded N(0,1) noise, time-major rows
    out_ref,         # (T*B, 3*HP)  [ z | decoded | kl (lane-broadcast) ]
):
    HP = ug_ref.shape[0]          # 128-lane padded hidden width
    TB = T * B
    f32 = jnp.float32

    # ---- 1. Input projection for all T steps, hoisted off the recurrent chain
    #         (single MXU pass); the two LSTM biases are already folded into bg.
    xg = jnp.dot(x_ref[...], wg_ref[...], preferred_element_type=f32) + bg_ref[...]

    # ---- 2. LSTM recurrence, fully unrolled (PyTorch gate order i, f, g, o).
    h = jnp.zeros((B, HP), f32)
    c = jnp.zeros((B, HP), f32)
    hs = []
    for t in range(T):
        xg_t = xg[t * B:(t + 1) * B, :]           # static, contiguous row slice
        if t == 0:
            gates = xg_t                          # h0 == 0 -> skip h @ W_hh
        else:
            gates = xg_t + jnp.dot(h, ug_ref[...], preferred_element_type=f32)
        # 128-lane-aligned gate slices (free vreg views thanks to per-gate padding).
        i_g = jax.nn.sigmoid(gates[:, 0 * HP:1 * HP])
        f_g = jax.nn.sigmoid(gates[:, 1 * HP:2 * HP])
        g_g = jnp.tanh(gates[:, 2 * HP:3 * HP])
        o_g = jax.nn.sigmoid(gates[:, 3 * HP:4 * HP])
        c = f_g * c + i_g * g_g
        h = o_g * jnp.tanh(c)
        hs.append(h)

    hs_all = jnp.concatenate(hs, axis=0)          # (T*B, HP), time-major rows

    # ---- 3. VAE head, batched over all B*T rows (one matmul per layer).
    h1 = jnp.maximum(
        jnp.dot(hs_all, w1_ref[...], preferred_element_type=f32) + b1_ref[...], 0.0)
    ml = jnp.dot(h1, w2_ref[...], preferred_element_type=f32) + b2_ref[...]  # fused fc21|fc22
    mu = ml[:, 0 * HP:1 * HP]
    logvar = ml[:, 1 * HP:2 * HP]

    std = jnp.exp(0.5 * logvar)
    z = mu + eps_ref[...] * std
    var = std * std                               # == exp(logvar); saves one EUP exp
    # Padded lanes contribute exactly 0 to KL: mu=0, logvar=0 -> 0.5*(1+0-0-1)=0.
    kl = 0.5 * jnp.sum(var + mu * mu - logvar - 1.0, axis=-1, keepdims=True)  # (TB, 1)

    h3 = jnp.maximum(
        jnp.dot(z, w3_ref[...], preferred_element_type=f32) + b3_ref[...], 0.0)
    dec = jnp.dot(h3, w4_ref[...], preferred_element_type=f32) + b4_ref[...]

    # ---- 4. Single lane-dense output slab (three aligned full-width stores).
    out_ref[:, 0 * HP:1 * HP] = z
    out_ref[:, 1 * HP:2 * HP] = dec
    out_ref[:, 2 * HP:3 * HP] = jnp.broadcast_to(kl, (TB, HP))


# ---------------------------------------------------------------------------
# One-time parameter packing (pre-transpose / pad / fuse) — NOT per-call.
# ---------------------------------------------------------------------------
def pack_kernel_params(p, lane_pad=128):
    HP = lane_pad
    w_ih, w_hh = p["w_ih"], p["w_hh"]
    Hr = w_hh.shape[1]            # rnn_hidden_size
    I = w_ih.shape[1]             # input_size
    H = p["w1"].shape[0]          # hidden_size
    L = p["w21"].shape[0]         # latent_size
    O = p["w4"].shape[0]          # fc4 out = input_size for SequentialVAE
    assert max(Hr, I, H, L, O) <= HP, "dims must fit one 128-lane block"

    wg = jnp.zeros((I, 4 * HP), jnp.float32)
    ug = jnp.zeros((HP, 4 * HP), jnp.float32)
    bg = jnp.zeros((1, 4 * HP), jnp.float32)
    for k in range(4):            # PyTorch gate order i, f, g, o
        wg = wg.at[:, k * HP:k * HP + Hr].set(w_ih[k * Hr:(k + 1) * Hr, :].T)
        ug = ug.at[:Hr, k * HP:k * HP + Hr].set(w_hh[k * Hr:(k + 1) * Hr, :].T)
        bg = bg.at[0, k * HP:k * HP + Hr].set(
            p["b_ih"][k * Hr:(k + 1) * Hr] + p["b_hh"][k * Hr:(k + 1) * Hr])

    w1 = jnp.zeros((HP, HP), jnp.float32).at[:Hr, :H].set(p["w1"].T)
    b1 = jnp.zeros((1, HP), jnp.float32).at[0, :H].set(p["b1"])
    w2 = (jnp.zeros((HP, 2 * HP), jnp.float32)
          .at[:H, 0:L].set(p["w21"].T)
          .at[:H, HP:HP + L].set(p["w22"].T))
    b2 = (jnp.zeros((1, 2 * HP), jnp.float32)
          .at[0, 0:L].set(p["b21"])
          .at[0, HP:HP + L].set(p["b22"]))
    w3 = jnp.zeros((HP, HP), jnp.float32).at[:L, :H].set(p["w3"].T)
    b3 = jnp.zeros((1, HP), jnp.float32).at[0, :H].set(p["b3"])
    w4 = jnp.zeros((HP, HP), jnp.float32).at[:H, :O].set(p["w4"].T)
    b4 = jnp.zeros((1, HP), jnp.float32).at[0, :O].set(p["b4"])

    return {"wg": wg, "ug": ug, "bg": bg, "w1": w1, "b1": b1,
            "w2": w2, "b2": b2, "w3": w3, "b3": b3, "w4": w4, "b4": b4}


# ---------------------------------------------------------------------------
# Wrapper: light layout plumbing + pallas_call (all arrays fit VMEM, no grid).
# ---------------------------------------------------------------------------
@jax.jit
def vae_forward(x, eps, kparams):
    """x: (B, T, input_size) f32; eps: (B*T, latent) f32 (row = b*T + t)."""
    B, T, I = x.shape
    TB = B * T
    L = eps.shape[-1]
    HP = kparams["ug"].shape[0]

    # Time-major row layout inside the kernel -> static contiguous per-step slices.
    x_tm = jnp.swapaxes(x.astype(jnp.float32), 0, 1).reshape(TB, I)
    eps_tm = jnp.swapaxes(eps.astype(jnp.float32).reshape(B, T, L), 0, 1).reshape(TB, L)
    eps_tm = jnp.pad(eps_tm, ((0, 0), (0, HP - L)))

    ins = (x_tm, kparams["wg"], kparams["ug"], kparams["bg"],
           kparams["w1"], kparams["b1"], kparams["w2"], kparams["b2"],
           kparams["w3"], kparams["b3"], kparams["w4"], kparams["b4"], eps_tm)

    vmem = pl.BlockSpec(memory_space=pltpu.MemorySpace.VMEM)
    slab = pl.pallas_call(
        functools.partial(_vae_kernel, B, T),
        out_shape=jax.ShapeDtypeStruct((TB, 3 * HP), jnp.float32),
        in_specs=[vmem] * len(ins),
        out_specs=vmem,
    )(*ins)

    # Un-permute back to the module's batch-major conventions.
    z = jnp.swapaxes(slab[:, :L].reshape(T, B, L), 0, 1).reshape(TB, L)
    decoded = jnp.swapaxes(slab[:, HP:HP + I].reshape(T, B, I), 0, 1)
    kl = slab[:, 2 * HP].reshape(T, B).T
    return z, decoded, kl


# ---------------------------------------------------------------------------
# Deterministic parameter init (PyTorch-style uniform(-k, k))
# ---------------------------------------------------------------------------
def init_params(key, input_size, latent_size, hidden_size, rnn_hidden_size):
    def uni(k, shape, fan_in):
        bound = 1.0 / jnp.sqrt(jnp.float32(fan_in))
        return jax.random.uniform(k, shape, jnp.float32, -bound, bound)

    ks = jax.random.split(key, 14)
    return {
        # path_encoder LSTM (single layer)
        "w_ih": uni(ks[0], (4 * rnn_hidden_size, input_size), rnn_hidden_size),
        "w_hh": uni(ks[1], (4 * rnn_hidden_size, rnn_hidden_size), rnn_hidden_size),
        "b_ih": uni(ks[2], (4 * rnn_hidden_size,), rnn_hidden_size),
        "b_hh": uni(ks[3], (4 * rnn_hidden_size,), rnn_hidden_size),
        # fc1: rnn_hidden -> hidden
        "w1": uni(ks[4], (hidden_size, rnn_hidden_size), rnn_hidden_size),
        "b1": uni(ks[5], (hidden_size,), rnn_hidden_size),
        # fc21 / fc22: hidden -> latent
        "w21": uni(ks[6], (latent_size, hidden_size), hidden_size),
        "b21": uni(ks[7], (latent_size,), hidden_size),
        "w22": uni(ks[8], (latent_size, hidden_size), hidden_size),
        "b22": uni(ks[9], (latent_size,), hidden_size),
        # fc3: latent -> hidden
        "w3": uni(ks[10], (hidden_size, latent_size), latent_size),
        "b3": uni(ks[11], (hidden_size,), latent_size),
        # fc4: hidden -> input_size
        "w4": uni(ks[12], (input_size, hidden_size), hidden_size),
        "b4": uni(ks[13], (input_size,), hidden_size),
    }


# ---------------------------------------------------------------------------
# Pure-JAX reference (mirrors PyTorch SequentialVAE.forward) for correctness.
# ---------------------------------------------------------------------------
def vae_reference(x, p, eps):
    B, T, I = x.shape
    Hr = p["w_hh"].shape[1]

    def step(carry, x_t):
        h, c = carry
        gates = x_t @ p["w_ih"].T + p["b_ih"] + h @ p["w_hh"].T + p["b_hh"]
        i = jax.nn.sigmoid(gates[:, 0 * Hr:1 * Hr])
        f = jax.nn.sigmoid(gates[:, 1 * Hr:2 * Hr])
        g = jnp.tanh(gates[:, 2 * Hr:3 * Hr])
        o = jax.nn.sigmoid(gates[:, 3 * Hr:4 * Hr])
        c = f * c + i * g
        h = o * jnp.tanh(c)
        return (h, c), h

    h0 = jnp.zeros((B, Hr), jnp.float32)
    (_, _), hs = lax.scan(step, (h0, h0), jnp.swapaxes(x, 0, 1))
    rnn_flat = jnp.swapaxes(hs, 0, 1).reshape(B * T, Hr)   # rnn_output.reshape(-1, Hr)

    h1 = jax.nn.relu(rnn_flat @ p["w1"].T + p["b1"])
    mu = h1 @ p["w21"].T + p["b21"]
    logvar = h1 @ p["w22"].T + p["b22"]
    z = mu + eps * jnp.exp(0.5 * logvar)
    kl = (0.5 * (jnp.exp(logvar) + mu ** 2 - logvar - 1.0)).reshape(B, T, -1).sum(-1)
    decoded = (jax.nn.relu(z @ p["w3"].T + p["b3"]) @ p["w4"].T + p["b4"]).reshape(B, T, I)
    return z, decoded, kl


if __name__ == "__main__":
    # Small shapes consistent with the module; B chosen as a sublane multiple (8).
    B, T = 8, 8
    input_size = 16
    latent_size = 16
    hidden_size = 32
    rnn_hidden_size = 32

    key = jax.random.PRNGKey(0)
    k_param, k_x, k_eps = jax.random.split(key, 3)

    params = init_params(k_param, input_size, latent_size, hidden_size, rnn_hidden_size)
    kparams = pack_kernel_params(params)     # one-time packing, not in the per-call path

    x = jax.random.normal(k_x, (B, T, input_size), jnp.float32)
    eps = jax.random.normal(k_eps, (B * T, latent_size), jnp.float32)

    z, decoded, kl = vae_forward(x, eps, kparams)
    jax.block_until_ready((z, decoded, kl))

    # Sanity check against the pure-JAX reference.
    z_r, dec_r, kl_r = vae_reference(x, params, eps)
    assert z.shape == (B * T, latent_size)
    assert decoded.shape == (B, T, input_size)
    assert kl.shape == (B, T)
    assert jnp.allclose(z, z_r, atol=2e-4, rtol=2e-4)
    assert jnp.allclose(decoded, dec_r, atol=2e-4, rtol=2e-4)
    assert jnp.allclose(kl, kl_r, atol=2e-4, rtol=2e-4)

    print("KERNEL_OK")
</pallas_src>

<mosaic_0001>
module attributes {stable_mosaic.version = 11 : i64} {
  func.func @_vae_kernel(%arg0: memref<64x16xf32, #tpu.memory_space<vmem>>, %arg1: memref<16x512xf32, #tpu.memory_space<vmem>>, %arg2: memref<128x512xf32, #tpu.memory_space<vmem>>, %arg3: memref<1x512xf32, #tpu.memory_space<vmem>>, %arg4: memref<128x128xf32, #tpu.memory_space<vmem>>, %arg5: memref<1x128xf32, #tpu.memory_space<vmem>>, %arg6: memref<128x256xf32, #tpu.memory_space<vmem>>, %arg7: memref<1x256xf32, #tpu.memory_space<vmem>>, %arg8: memref<128x128xf32, #tpu.memory_space<vmem>>, %arg9: memref<1x128xf32, #tpu.memory_space<vmem>>, %arg10: memref<128x128xf32, #tpu.memory_space<vmem>>, %arg11: memref<1x128xf32, #tpu.memory_space<vmem>>, %arg12: memref<64x128xf32, #tpu.memory_space<vmem>>, %arg13: memref<64x384xf32, #tpu.memory_space<vmem>>) attributes {dimension_semantics = [], scalar_prefetch = 0 : i64, scratch_operands = 0 : i64, tpu.core_type = #tpu.core_type<tc>} {
    %c0 = arith.constant 0 : index
    %c0_0 = arith.constant 0 : index
    %0 = vector.load %arg0[%c0, %c0_0] : memref<64x16xf32, #tpu.memory_space<vmem>>, vector<64x16xf32>
    %c0_1 = arith.constant 0 : index
    %c0_2 = arith.constant 0 : index
    %1 = vector.load %arg1[%c0_1, %c0_2] : memref<16x512xf32, #tpu.memory_space<vmem>>, vector<16x512xf32>
    %cst = arith.constant dense<0.000000e+00> : vector<64x512xf32>
    %2 = tpu.matmul %0, %1, %cst {dimension_numbers = #tpu.dot_dimension_numbers<[1], [0], [0], [1], [0, 0, 1, 1], [], []>} : vector<64x16xf32>, vector<16x512xf32>, vector<64x512xf32> -> vector<64x512xf32>
    %c0_3 = arith.constant 0 : index
    %c0_4 = arith.constant 0 : index
    %3 = vector.load %arg3[%c0_3, %c0_4] : memref<1x512xf32, #tpu.memory_space<vmem>>, vector<1x512xf32>
    %4 = vector.broadcast %3 : vector<1x512xf32> to vector<64x512xf32>
    %5 = arith.addf %2, %4 : vector<64x512xf32>
    %cst_5 = arith.constant 0.000000e+00 : f32
    %6 = vector.broadcast %cst_5 : f32 to vector<8x128xf32>
    %7 = vector.extract_strided_slice %5 {offsets = [0, 0], sizes = [8, 512], strides = [1, 1]} : vector<64x512xf32> to vector<8x512xf32>
    %8 = vector.extract_strided_slice %7 {offsets = [0, 0], sizes = [8, 128], strides = [1, 1]} : vector<8x512xf32> to vector<8x128xf32>
    %9 = arith.negf %8 : vector<8x128xf32>
    %10 = math.exp %9 : vector<8x128xf32>
    %cst_6 = arith.constant 1.000000e+00 : f32
    %11 = vector.broadcast %cst_6 : f32 to vector<8x128xf32>
    %12 = arith.addf %11, %10 : vector<8x128xf32>
    %13 = arith.divf %11, %12 : vector<8x128xf32>
    %14 = vector.extract_strided_slice %7 {offsets = [0, 128], sizes = [8, 128], strides = [1, 1]} : vector<8x512xf32> to vector<8x128xf32>
    %15 = arith.negf %14 : vector<8x128xf32>
    %16 = math.exp %15 : vector<8x128xf32>
    %cst_7 = arith.constant 1.000000e+00 : f32
    %17 = vector.broadcast %cst_7 : f32 to vector<8x128xf32>
    %18 = arith.addf %17, %16 : vector<8x128xf32>
    %19 = arith.divf %17, %18 : vector<8x128xf32>
    %20 = vector.extract_strided_slice %7 {offsets = [0, 256], sizes = [8, 128], strides = [1, 1]} : vector<8x512xf32> to vector<8x128xf32>
    %21 = math.tanh %20 : vector<8x128xf32>
    %22 = vector.extract_strided_slice %7 {offsets = [0, 384], sizes = [8, 128], strides = [1, 1]} : vector<8x512xf32> to vector<8x128xf32>
    %23 = arith.negf %22 : vector<8x128xf32>
    %24 = math.exp %23 : vector<8x128xf32>
    %cst_8 = arith.constant 1.000000e+00 : f32
    %25 = vector.broadcast %cst_8 : f32 to vector<8x128xf32>
    %26 = arith.addf %25, %24 : vector<8x128xf32>
    %27 = arith.divf %25, %26 : vector<8x128xf32>
    %28 = arith.mulf %19, %6 : vector<8x128xf32>
    %29 = arith.mulf %13, %21 : vector<8x128xf32>
    %30 = arith.addf %28, %29 : vector<8x128xf32>
    %31 = math.tanh %30 : vector<8x128xf32>
    %32 = arith.mulf %27, %31 : vector<8x128xf32>
    %33 = vector.extract_strided_slice %5 {offsets = [8, 0], sizes = [8, 512], strides = [1, 1]} : vector<64x512xf32> to vector<8x512xf32>
    %c0_9 = arith.constant 0 : index
    %c0_10 = arith.constant 0 : index
    %34 = vector.load %arg2[%c0_9, %c0_10] : memref<128x512xf32, #tpu.memory_space<vmem>>, vector<128x512xf32>
    %cst_11 = arith.constant dense<0.000000e+00> : vector<8x512xf32>
    %35 = tpu.matmul %32, %34, %cst_11 {dimension_numbers = #tpu.dot_dimension_numbers<[1], [0], [0], [1], [0, 0, 1, 1], [], []>} : vector<8x128xf32>, vector<128x512xf32>, vector<8x512xf32> -> vector<8x512xf32>
    %36 = arith.addf %33, %35 : vector<8x512xf32>
    %37 = vector.extract_strided_slice %36 {offsets = [0, 0], sizes = [8, 128], strides = [1, 1]} : vector<8x512xf32> to vector<8x128xf32>
    %38 = arith.negf %37 : vector<8x128xf32>
    %39 = math.exp %38 : vector<8x128xf32>
    %cst_12 = arith.constant 1.000000e+00 : f32
    %40 = vector.broadcast %cst_12 : f32 to vector<8x128xf32>
    %41 = arith.addf %40, %39 : vector<8x128xf32>
    %42 = arith.divf %40, %41 : vector<8x128xf32>
    %43 = vector.extract_strided_slice %36 {offsets = [0, 128], sizes = [8, 128], strides = [1, 1]} : vector<8x512xf32> to vector<8x128xf32>
    %44 = arith.negf %43 : vector<8x128xf32>
    %45 = math.exp %44 : vector<8x128xf32>
    %cst_13 = arith.constant 1.000000e+00 : f32
    %46 = vector.broadcast %cst_13 : f32 to vector<8x128xf32>
    %47 = arith.addf %46, %45 : vector<8x128xf32>
    %48 = arith.divf %46, %47 : vector<8x128xf32>
    %49 = vector.extract_strided_slice %36 {offsets = [0, 256], sizes = [8, 128], strides = [1, 1]} : vector<8x512xf32> to vector<8x128xf32>
    %50 = math.tanh %49 : vector<8x128xf32>
    %51 = vector.extract_strided_slice %36 {offsets = [0, 384], sizes = [8, 128], strides = [1, 1]} : vector<8x512xf32> to vector<8x128xf32>
    %52 = arith.negf %51 : vector<8x128xf32>
    %53 = math.exp %52 : vector<8x128xf32>
    %cst_14 = arith.constant 1.000000e+00 : f32
    %54 = vector.broadcast %cst_14 : f32 to vector<8x128xf32>
    %55 = arith.addf %54, %53 : vector<8x128xf32>
    %56 = arith.divf %54, %55 : vector<8x128xf32>
    %57 = arith.mulf %48, %30 : vector<8x128xf32>
    %58 = arith.mulf %42, %50 : vector<8x128xf32>
    %59 = arith.addf %57, %58 : vector<8x128xf32>
    %60 = math.tanh %59 : vector<8x128xf32>
    %61 = arith.mulf %56, %60 : vector<8x128xf32>
    %62 = vector.extract_strided_slice %5 {offsets = [16, 0], sizes = [8, 512], strides = [1, 1]} : vector<64x512xf32> to vector<8x512xf32>
    %c0_15 = arith.constant 0 : index
    %c0_16 = arith.constant 0 : index
    %63 = vector.load %arg2[%c0_15, %c0_16] : memref<128x512xf32, #tpu.memory_space<vmem>>, vector<128x512xf32>
    %cst_17 = arith.constant dense<0.000000e+00> : vector<8x512xf32>
    %64 = tpu.matmul %61, %63, %cst_17 {dimension_numbers = #tpu.dot_dimension_numbers<[1], [0], [0], [1], [0, 0, 1, 1], [], []>} : vector<8x128xf32>, vector<128x512xf32>, vector<8x512xf32> -> vector<8x512xf32>
    %65 = arith.addf %62, %64 : vector<8x512xf32>
    %66 = vector.extract_strided_slice %65 {offsets = [0, 0], sizes = [8, 128], strides = [1, 1]} : vector<8x512xf32> to vector<8x128xf32>
    %67 = arith.negf %66 : vector<8x128xf32>
    %68 = math.exp %67 : vector<8x128xf32>
    %cst_18 = arith.constant 1.000000e+00 : f32
    %69 = vector.broadcast %cst_18 : f32 to vector<8x128xf32>
    %70 = arith.addf %69, %68 : vector<8x128xf32>
    %71 = arith.divf %69, %70 : vector<8x128xf32>
    %72 = vector.extract_strided_slice %65 {offsets = [0, 128], sizes = [8, 128], strides = [1, 1]} : vector<8x512xf32> to vector<8x128xf32>
    %73 = arith.negf %72 : vector<8x128xf32>
    %74 = math.exp %73 : vector<8x128xf32>
    %cst_19 = arith.constant 1.000000e+00 : f32
    %75 = vector.broadcast %cst_19 : f32 to vector<8x128xf32>
    %76 = arith.addf %75, %74 : vector<8x128xf32>
    %77 = arith.divf %75, %76 : vector<8x128xf32>
    %78 = vector.extract_strided_slice %65 {offsets = [0, 256], sizes = [8, 128], strides = [1, 1]} : vector<8x512xf32> to vector<8x128xf32>
    %79 = math.tanh %78 : vector<8x128xf32>
    %80 = vector.extract_strided_slice %65 {offsets = [0, 384], sizes = [8, 128], strides = [1, 1]} : vector<8x512xf32> to vector<8x128xf32>
    %81 = arith.negf %80 : vector<8x128xf32>
    %82 = math.exp %81 : vector<8x128xf32>
    %cst_20 = arith.constant 1.000000e+00 : f32
    %83 = vector.broadcast %cst_20 : f32 to vector<8x128xf32>
    %84 = arith.addf %83, %82 : vector<8x128xf32>
    %85 = arith.divf %83, %84 : vector<8x128xf32>
    %86 = arith.mulf %77, %59 : vector<8x128xf32>
    %87 = arith.mulf %71, %79 : vector<8x128xf32>
    %88 = arith.addf %86, %87 : vector<8x128xf32>
    %89 = math.tanh %88 : vector<8x128xf32>
    %90 = arith.mulf %85, %89 : vector<8x128xf32>
    %91 = vector.extract_strided_slice %5 {offsets = [24, 0], sizes = [8, 512], strides = [1, 1]} : vector<64x512xf32> to vector<8x512xf32>
    %c0_21 = arith.constant 0 : index
    %c0_22 = arith.constant 0 : index
    %92 = vector.load %arg2[%c0_21, %c0_22] : memref<128x512xf32, #tpu.memory_space<vmem>>, vector<128x512xf32>
    %cst_23 = arith.constant dense<0.000000e+00> : vector<8x512xf32>
    %93 = tpu.matmul %90, %92, %cst_23 {dimension_numbers = #tpu.dot_dimension_numbers<[1], [0], [0], [1], [0, 0, 1, 1], [], []>} : vector<8x128xf32>, vector<128x512xf32>, vector<8x512xf32> -> vector<8x512xf32>
    %94 = arith.addf %91, %93 : vector<8x512xf32>
    %95 = vector.extract_strided_slice %94 {offsets = [0, 0], sizes = [8, 128], strides = [1, 1]} : vector<8x512xf32> to vector<8x128xf32>
    %96 = arith.negf %95 : vector<8x128xf32>
    %97 = math.exp %96 : vector<8x128xf32>
    %cst_24 = arith.constant 1.000000e+00 : f32
    %98 = vector.broadcast %cst_24 : f32 to vector<8x128xf32>
    %99 = arith.addf %98, %97 : vector<8x128xf32>
    %100 = arith.divf %98, %99 : vector<8x128xf32>
    %101 = vector.extract_strided_slice %94 {offsets = [0, 128], sizes = [8, 128], strides = [1, 1]} : vector<8x512xf32> to vector<8x128xf32>
    %102 = arith.negf %101 : vector<8x128xf32>
    %103 = math.exp %102 : vector<8x128xf32>
    %cst_25 = arith.constant 1.000000e+00 : f32
    %104 = vector.broadcast %cst_25 : f32 to vector<8x128xf32>
    %105 = arith.addf %104, %103 : vector<8x128xf32>
    %106 = arith.divf %104, %105 : vector<8x128xf32>
    %107 = vector.extract_strided_slice %94 {offsets = [0, 256], sizes = [8, 128], strides = [1, 1]} : vector<8x512xf32> to vector<8x128xf32>
    %108 = math.tanh %107 : vector<8x128xf32>
    %109 = vector.extract_strided_slice %94 {offsets = [0, 384], sizes = [8, 128], strides = [1, 1]} : vector<8x512xf32> to vector<8x128xf32>
    %110 = arith.negf %109 : vector<8x128xf32>
    %111 = math.exp %110 : vector<8x128xf32>
    %cst_26 = arith.constant 1.000000e+00 : f32
    %112 = vector.broadcast %cst_26 : f32 to vector<8x128xf32>
    %113 = arith.addf %112, %111 : vector<8x128xf32>
    %114 = arith.divf %112, %113 : vector<8x128xf32>
    %115 = arith.mulf %106, %88 : vector<8x128xf32>
    %116 = arith.mulf %100, %108 : vector<8x128xf32>
    %117 = arith.addf %115, %116 : vector<8x128xf32>
    %118 = math.tanh %117 : vector<8x128xf32>
    %119 = arith.mulf %114, %118 : vector<8x128xf32>
    %120 = vector.extract_strided_slice %5 {offsets = [32, 0], sizes = [8, 512], strides = [1, 1]} : vector<64x512xf32> to vector<8x512xf32>
    %c0_27 = arith.constant 0 : index
    %c0_28 = arith.constant 0 : index
    %121 = vector.load %arg2[%c0_27, %c0_28] : memref<128x512xf32, #tpu.memory_space<vmem>>, vector<128x512xf32>
    %cst_29 = arith.constant dense<0.000000e+00> : vector<8x512xf32>
    %122 = tpu.matmul %119, %121, %cst_29 {dimension_numbers = #tpu.dot_dimension_numbers<[1], [0], [0], [1], [0, 0, 1, 1], [], []>} : vector<8x128xf32>, vector<128x512xf32>, vector<8x512xf32> -> vector<8x512xf32>
    %123 = arith.addf %120, %122 : vector<8x512xf32>
    %124 = vector.extract_strided_slice %123 {offsets = [0, 0], sizes = [8, 128], strides = [1, 1]} : vector<8x512xf32> to vector<8x128xf32>
    %125 = arith.negf %124 : vector<8x128xf32>
    %126 = math.exp %125 : vector<8x128xf32>
    %cst_30 = arith.constant 1.000000e+00 : f32
    %127 = vector.broadcast %cst_30 : f32 to vector<8x128xf32>
    %128 = arith.addf %127, %126 : vector<8x128xf32>
    %129 = arith.divf %127, %128 : vector<8x128xf32>
    %130 = vector.extract_strided_slice %123 {offsets = [0, 128], sizes = [8, 128], strides = [1, 1]} : vector<8x512xf32> to vector<8x128xf32>
    %131 = arith.negf %130 : vector<8x128xf32>
    %132 = math.exp %131 : vector<8x128xf32>
    %cst_31 = arith.constant 1.000000e+00 : f32
    %133 = vector.broadcast %cst_31 : f32 to vector<8x128xf32>
    %134 = arith.addf %133, %132 : vector<8x128xf32>
    %135 = arith.divf %133, %134 : vector<8x128xf32>
    %136 = vector.extract_strided_slice %123 {offsets = [0, 256], sizes = [8, 128], strides = [1, 1]} : vector<8x512xf32> to vector<8x128xf32>
    %137 = math.tanh %136 : vector<8x128xf32>
    %138 = vector.extract_strided_slice %123 {offsets = [0, 384], sizes = [8, 128], strides = [1, 1]} : vector<8x512xf32> to vector<8x128xf32>
    %139 = arith.negf %138 : vector<8x128xf32>
    %140 = math.exp %139 : vector<8x128xf32>
    %cst_32 = arith.constant 1.000000e+00 : f32
    %141 = vector.broadcast %cst_32 : f32 to vector<8x128xf32>
    %142 = arith.addf %141, %140 : vector<8x128xf32>
    %143 = arith.divf %141, %142 : vector<8x128xf32>
    %144 = arith.mulf %135, %117 : vector<8x128xf32>
    %145 = arith.mulf %129, %137 : vector<8x128xf32>
    %146 = arith.addf %144, %145 : vector<8x128xf32>
    %147 = math.tanh %146 : vector<8x128xf32>
    %148 = arith.mulf %143, %147 : vector<8x128xf32>
    %149 = vector.extract_strided_slice %5 {offsets = [40, 0], sizes = [8, 512], strides = [1, 1]} : vector<64x512xf32> to vector<8x512xf32>
    %c0_33 = arith.constant 0 : index
    %c0_34 = arith.constant 0 : index
    %150 = vector.load %arg2[%c0_33, %c0_34] : memref<128x512xf32, #tpu.memory_space<vmem>>, vector<128x512xf32>
    %cst_35 = arith.constant dense<0.000000e+00> : vector<8x512xf32>
    %151 = tpu.matmul %148, %150, %cst_35 {dimension_numbers = #tpu.dot_dimension_numbers<[1], [0], [0], [1], [0, 0, 1, 1], [], []>} : vector<8x128xf32>, vector<128x512xf32>, vector<8x512xf32> -> vector<8x512xf32>
    %152 = arith.addf %149, %151 : vector<8x512xf32>
    %153 = vector.extract_strided_slice %152 {offsets = [0, 0], sizes = [8, 128], strides = [1, 1]} : vector<8x512xf32> to vector<8x128xf32>
    %154 = arith.negf %153 : vector<8x128xf32>
    %155 = math.exp %154 : vector<8x128xf32>
    %cst_36 = arith.constant 1.000000e+00 : f32
    %156 = vector.broadcast %cst_36 : f32 to vector<8x128xf32>
    %157 = arith.addf %156, %155 : vector<8x128xf32>
    %158 = arith.divf %156, %157 : vector<8x128xf32>
    %159 = vector.extract_strided_slice %152 {offsets = [0, 128], sizes = [8, 128], strides = [1, 1]} : vector<8x512xf32> to vector<8x128xf32>
    %160 = arith.negf %159 : vector<8x128xf32>
    %161 = math.exp %160 : vector<8x128xf32>
    %cst_37 = arith.constant 1.000000e+00 : f32
    %162 = vector.broadcast %cst_37 : f32 to vector<8x128xf32>
    %163 = arith.addf %162, %161 : vector<8x128xf32>
    %164 = arith.divf %162, %163 : vector<8x128xf32>
    %165 = vector.extract_strided_slice %152 {offsets = [0, 256], sizes = [8, 128], strides = [1, 1]} : vector<8x512xf32> to vector<8x128xf32>
    %166 = math.tanh %165 : vector<8x128xf32>
    %167 = vector.extract_strided_slice %152 {offsets = [0, 384], sizes = [8, 128], strides = [1, 1]} : vector<8x512xf32> to vector<8x128xf32>
    %168 = arith.negf %167 : vector<8x128xf32>
    %169 = math.exp %168 : vector<8x128xf32>
    %cst_38 = arith.constant 1.000000e+00 : f32
    %170 = vector.broadcast %cst_38 : f32 to vector<8x128xf32>
    %171 = arith.addf %170, %169 : vector<8x128xf32>
    %172 = arith.divf %170, %171 : vector<8x128xf32>
    %173 = arith.mulf %164, %146 : vector<8x128xf32>
    %174 = arith.mulf %158, %166 : vector<8x128xf32>
    %175 = arith.addf %173, %174 : vector<8x128xf32>
    %176 = math.tanh %175 : vector<8x128xf32>
    %177 = arith.mulf %172, %176 : vector<8x128xf32>
    %178 = vector.extract_strided_slice %5 {offsets = [48, 0], sizes = [8, 512], strides = [1, 1]} : vector<64x512xf32> to vector<8x512xf32>
    %c0_39 = arith.constant 0 : index
    %c0_40 = arith.constant 0 : index
    %179 = vector.load %arg2[%c0_39, %c0_40] : memref<128x512xf32, #tpu.memory_space<vmem>>, vector<128x512xf32>
    %cst_41 = arith.constant dense<0.000000e+00> : vector<8x512xf32>
    %180 = tpu.matmul %177, %179, %cst_41 {dimension_numbers = #tpu.dot_dimension_numbers<[1], [0], [0], [1], [0, 0, 1, 1], [], []>} : vector<8x128xf32>, vector<128x512xf32>, vector<8x512xf32> -> vector<8x512xf32>
    %181 = arith.addf %178, %180 : vector<8x512xf32>
    %182 = vector.extract_strided_slice %181 {offsets = [0, 0], sizes = [8, 128], strides = [1, 1]} : vector<8x512xf32> to vector<8x128xf32>
    %183 = arith.negf %182 : vector<8x128xf32>
    %184 = math.exp %183 : vector<8x128xf32>
    %cst_42 = arith.constant 1.000000e+00 : f32
    %185 = vector.broadcast %cst_42 : f32 to vector<8x128xf32>
    %186 = arith.addf %185, %184 : vector<8x128xf32>
    %187 = arith.divf %185, %186 : vector<8x128xf32>
    %188 = vector.extract_strided_slice %181 {offsets = [0, 128], sizes = [8, 128], strides = [1, 1]} : vector<8x512xf32> to vector<8x128xf32>
    %189 = arith.negf %188 : vector<8x128xf32>
    %190 = math.exp %189 : vector<8x128xf32>
    %cst_43 = arith.constant 1.000000e+00 : f32
    %191 = vector.broadcast %cst_43 : f32 to vector<8x128xf32>
    %192 = arith.addf %191, %190 : vector<8x128xf32>
    %193 = arith.divf %191, %192 : vector<8x128xf32>
    %194 = vector.extract_strided_slice %181 {offsets = [0, 256], sizes = [8, 128], strides = [1, 1]} : vector<8x512xf32> to vector<8x128xf32>
    %195 = math.tanh %194 : vector<8x128xf32>
    %196 = vector.extract_strided_slice %181 {offsets = [0, 384], sizes = [8, 128], strides = [1, 1]} : vector<8x512xf32> to vector<8x128xf32>
    %197 = arith.negf %196 : vector<8x128xf32>
    %198 = math.exp %197 : vector<8x128xf32>
    %cst_44 = arith.constant 1.000000e+00 : f32
    %199 = vector.broadcast %cst_44 : f32 to vector<8x128xf32>
    %200 = arith.addf %199, %198 : vector<8x128xf32>
    %201 = arith.divf %199, %200 : vector<8x128xf32>
    %202 = arith.mulf %193, %175 : vector<8x128xf32>
    %203 = arith.mulf %187, %195 : vector<8x128xf32>
    %204 = arith.addf %202, %203 : vector<8x128xf32>
    %205 = math.tanh %204 : vector<8x128xf32>
    %206 = arith.mulf %201, %205 : vector<8x128xf32>
    %207 = vector.extract_strided_slice %5 {offsets = [56, 0], sizes = [8, 512], strides = [1, 1]} : vector<64x512xf32> to vector<8x512xf32>
    %c0_45 = arith.constant 0 : index
    %c0_46 = arith.constant 0 : index
    %208 = vector.load %arg2[%c0_45, %c0_46] : memref<128x512xf32, #tpu.memory_space<vmem>>, vector<128x512xf32>
    %cst_47 = arith.constant dense<0.000000e+00> : vector<8x512xf32>
    %209 = tpu.matmul %206, %208, %cst_47 {dimension_numbers = #tpu.dot_dimension_numbers<[1], [0], [0], [1], [0, 0, 1, 1], [], []>} : vector<8x128xf32>, vector<128x512xf32>, vector<8x512xf32> -> vector<8x512xf32>
    %210 = arith.addf %207, %209 : vector<8x512xf32>
    %211 = vector.extract_strided_slice %210 {offsets = [0, 0], sizes = [8, 128], strides = [1, 1]} : vector<8x512xf32> to vector<8x128xf32>
    %212 = arith.negf %211 : vector<8x128xf32>
    %213 = math.exp %212 : vector<8x128xf32>
    %cst_48 = arith.constant 1.000000e+00 : f32
    %214 = vector.broadcast %cst_48 : f32 to vector<8x128xf32>
    %215 = arith.addf %214, %213 : vector<8x128xf32>
    %216 = arith.divf %214, %215 : vector<8x128xf32>
    %217 = vector.extract_strided_slice %210 {offsets = [0, 128], sizes = [8, 128], strides = [1, 1]} : vector<8x512xf32> to vector<8x128xf32>
    %218 = arith.negf %217 : vector<8x128xf32>
    %219 = math.exp %218 : vector<8x128xf32>
    %cst_49 = arith.constant 1.000000e+00 : f32
    %220 = vector.broadcast %cst_49 : f32 to vector<8x128xf32>
    %221 = arith.addf %220, %219 : vector<8x128xf32>
    %222 = arith.divf %220, %221 : vector<8x128xf32>
    %223 = vector.extract_strided_slice %210 {offsets = [0, 256], sizes = [8, 128], strides = [1, 1]} : vector<8x512xf32> to vector<8x128xf32>
    %224 = math.tanh %223 : vector<8x128xf32>
    %225 = vector.extract_strided_slice %210 {offsets = [0, 384], sizes = [8, 128], strides = [1, 1]} : vector<8x512xf32> to vector<8x128xf32>
    %226 = arith.negf %225 : vector<8x128xf32>
    %227 = math.exp %226 : vector<8x128xf32>
    %cst_50 = arith.constant 1.000000e+00 : f32
    %228 = vector.broadcast %cst_50 : f32 to vector<8x128xf32>
    %229 = arith.addf %228, %227 : vector<8x128xf32>
    %230 = arith.divf %228, %229 : vector<8x128xf32>
    %231 = arith.mulf %222, %204 : vector<8x128xf32>
    %232 = arith.mulf %216, %224 : vector<8x128xf32>
    %233 = arith.addf %231, %232 : vector<8x128xf32>
    %234 = math.tanh %233 : vector<8x128xf32>
    %235 = arith.mulf %230, %234 : vector<8x128xf32>
    %236 = tpu.concatenate %32, %61, %90, %119, %148, %177, %206, %235 in 0 : vector<8x128xf32>, vector<8x128xf32>, vector<8x128xf32>, vector<8x128xf32>, vector<8x128xf32>, vector<8x128xf32>, vector<8x128xf32>, vector<8x128xf32> -> vector<64x128xf32>
    %c0_51 = arith.constant 0 : index
    %c0_52 = arith.constant 0 : index
    %237 = vector.load %arg4[%c0_51, %c0_52] : memref<128x128xf32, #tpu.memory_space<vmem>>, vector<128x128xf32>
    %cst_53 = arith.constant dense<0.000000e+00> : vector<64x128xf32>
    %238 = tpu.matmul %236, %237, %cst_53 {dimension_numbers = #tpu.dot_dimension_numbers<[1], [0], [0], [1], [0, 0, 1, 1], [], []>} : vector<64x128xf32>, vector<128x128xf32>, vector<64x128xf32> -> vector<64x128xf32>
    %c0_54 = arith.constant 0 : index
    %c0_55 = arith.constant 0 : index
    %239 = vector.load %arg5[%c0_54, %c0_55] : memref<1x128xf32, #tpu.memory_space<vmem>>, vector<1x128xf32>
    %240 = vector.broadcast %239 : vector<1x128xf32> to vector<64x128xf32>
    %241 = arith.addf %238, %240 : vector<64x128xf32>
    %cst_56 = arith.constant 0.000000e+00 : f32
    %242 = vector.broadcast %cst_56 : f32 to vector<64x128xf32>
    %243 = arith.maximumf %241, %242 : vector<64x128xf32>
    %c0_57 = arith.constant 0 : index
    %c0_58 = arith.constant 0 : index
    %244 = vector.load %arg6[%c0_57, %c0_58] : memref<128x256xf32, #tpu.memory_space<vmem>>, vector<128x256xf32>
    %cst_59 = arith.constant dense<0.000000e+00> : vector<64x256xf32>
    %245 = tpu.matmul %243, %244, %cst_59 {dimension_numbers = #tpu.dot_dimension_numbers<[1], [0], [0], [1], [0, 0, 1, 1], [], []>} : vector<64x128xf32>, vector<128x256xf32>, vector<64x256xf32> -> vector<64x256xf32>
    %c0_60 = arith.constant 0 : index
    %c0_61 = arith.constant 0 : index
    %246 = vector.load %arg7[%c0_60, %c0_61] : memref<1x256xf32, #tpu.memory_space<vmem>>, vector<1x256xf32>
    %247 = vector.broadcast %246 : vector<1x256xf32> to vector<64x256xf32>
    %248 = arith.addf %245, %247 : vector<64x256xf32>
    %249 = vector.extract_strided_slice %248 {offsets = [0, 0], sizes = [64, 128], strides = [1, 1]} : vector<64x256xf32> to vector<64x128xf32>
    %250 = vector.extract_strided_slice %248 {offsets = [0, 128], sizes = [64, 128], strides = [1, 1]} : vector<64x256xf32> to vector<64x128xf32>
    %cst_62 = arith.constant 5.000000e-01 : f32
    %251 = vector.broadcast %cst_62 : f32 to vector<64x128xf32>
    %252 = arith.mulf %251, %250 : vector<64x128xf32>
    %253 = math.exp %252 : vector<64x128xf32>
    %c0_63 = arith.constant 0 : index
    %c0_64 = arith.constant 0 : index
    %254 = vector.load %arg12[%c0_63, %c0_64] : memref<64x128xf32, #tpu.memory_space<vmem>>, vector<64x128xf32>
    %255 = arith.mulf %254, %253 : vector<64x128xf32>
    %256 = arith.addf %249, %255 : vector<64x128xf32>
    %257 = arith.mulf %253, %253 : vector<64x128xf32>
    %258 = arith.mulf %249, %249 : vector<64x128xf32>
    %259 = arith.addf %257, %258 : vector<64x128xf32>
    %260 = arith.subf %259, %250 : vector<64x128xf32>
    %cst_65 = arith.constant 1.000000e+00 : f32
    %261 = vector.broadcast %cst_65 : f32 to vector<64x128xf32>
    %262 = arith.subf %260, %261 : vector<64x128xf32>
    %cst_66 = arith.constant dense<0.000000e+00> : vector<64xf32>
    %263 = vector.multi_reduction <add>, %262, %cst_66 [1] : vector<64x128xf32> to vector<64xf32>
    %264 = vector.shape_cast %263 : vector<64xf32> to vector<64x1xf32>
    %cst_67 = arith.constant 5.000000e-01 : f32
    %265 = vector.broadcast %cst_67 : f32 to vector<64x1xf32>
    %266 = arith.mulf %265, %264 : vector<64x1xf32>
    %c0_68 = arith.constant 0 : index
    %c0_69 = arith.constant 0 : index
    %267 = vector.load %arg8[%c0_68, %c0_69] : memref<128x128xf32, #tpu.memory_space<vmem>>, vector<128x128xf32>
    %cst_70 = arith.constant dense<0.000000e+00> : vector<64x128xf32>
    %268 = tpu.matmul %256, %267, %cst_70 {dimension_numbers = #tpu.dot_dimension_numbers<[1], [0], [0], [1], [0, 0, 1, 1], [], []>} : vector<64x128xf32>, vector<128x128xf32>, vector<64x128xf32> -> vector<64x128xf32>
    %c0_71 = arith.constant 0 : index
    %c0_72 = arith.constant 0 : index
    %269 = vector.load %arg9[%c0_71, %c0_72] : memref<1x128xf32, #tpu.memory_space<vmem>>, vector<1x128xf32>
    %270 = vector.broadcast %269 : vector<1x128xf32> to vector<64x128xf32>
    %271 = arith.addf %268, %270 : vector<64x128xf32>
    %cst_73 = arith.constant 0.000000e+00 : f32
    %272 = vector.broadcast %cst_73 : f32 to vector<64x128xf32>
    %273 = arith.maximumf %271, %272 : vector<64x128xf32>
    %c0_74 = arith.constant 0 : index
    %c0_75 = arith.constant 0 : index
    %274 = vector.load %arg10[%c0_74, %c0_75] : memref<128x128xf32, #tpu.memory_space<vmem>>, vector<128x128xf32>
    %cst_76 = arith.constant dense<0.000000e+00> : vector<64x128xf32>
    %275 = tpu.matmul %273, %274, %cst_76 {dimension_numbers = #tpu.dot_dimension_numbers<[1], [0], [0], [1], [0, 0, 1, 1], [], []>} : vector<64x128xf32>, vector<128x128xf32>, vector<64x128xf32> -> vector<64x128xf32>
    %c0_77 = arith.constant 0 : index
    %c0_78 = arith.constant 0 : index
    %276 = vector.load %arg11[%c0_77, %c0_78] : memref<1x128xf32, #tpu.memory_space<vmem>>, vector<1x128xf32>
    %277 = vector.broadcast %276 : vector<1x128xf32> to vector<64x128xf32>
    %278 = arith.addf %275, %277 : vector<64x128xf32>
    %c0_79 = arith.constant 0 : index
    %c0_80 = arith.constant 0 : index
    %279 = vector.load %arg13[%c0_79, %c0_80] : memref<64x384xf32, #tpu.memory_space<vmem>>, vector<64x128xf32>
    tpu.vector_store %arg13[%c0_79, %c0_80], %256 {strides = array<i32>} : memref<64x384xf32, #tpu.memory_space<vmem>>, vector<64x128xf32>,
    %c0_81 = arith.constant 0 : index
    %c128 = arith.constant 128 : index
    %280 = vector.load %arg13[%c0_81, %c128] : memref<64x384xf32, #tpu.memory_space<vmem>>, vector<64x128xf32>
    tpu.vector_store %arg13[%c0_81, %c128], %278 {strides = array<i32>} : memref<64x384xf32, #tpu.memory_space<vmem>>, vector<64x128xf32>,
    %281 = vector.shape_cast %266 : vector<64x1xf32> to vector<64x1xf32>
    %282 = vector.broadcast %281 : vector<64x1xf32> to vector<64x128xf32>
    %c0_82 = arith.constant 0 : index
    %c256 = arith.constant 256 : index
    %283 = vector.load %arg13[%c0_82, %c256] : memref<64x384xf32, #tpu.memory_space<vmem>>, vector<64x128xf32>
    tpu.vector_store %arg13[%c0_82, %c256], %282 {strides = array<i32>} : memref<64x384xf32, #tpu.memory_space<vmem>>, vector<64x128xf32>,
    return
  }
}

</mosaic_0001>

<bundles_post_ra>
// kernel: squeeze.1
= control target key start
LH: loop header
LB: loop body
LE: loop exit
PB: predicated region body
PF: predicated region fallthrough
CT: control target
= control target key end

     0   :  { %s66_s8 = smov 104   ;;  %vm7_vm0 = vcmask 64512   ;;  %s67_s11 = smov 112   ;;  %s117_s0 = inlined_call_operand.vmem [shape: f32[64], index: 0, kind: input, shape index: {}]   ;;  %s118_s1 = inlined_call_operand.vmem [shape: f32[8,8], index: 1, kind: output, shape index: {}]  }
   0x1   :  { %v4_v0 = vld [vmem:[%s117_s0] sm:$0x1]  ;;  %s65_s0 = smov 120   ;;  %s68_s12 = smov 96  }
   0x2   :  { %5 = vst [vmem:[#allocation0] sm:$0x1] %v4_v0  ;;  %s69_s13 = smov 88   ;;  %s70_s14 = smov 80  }
   0x3   :  { %s71_s15 = smov 72  }
   0x9   :  { %v9_v1 = vld [vmem:[#allocation0] sm:$0x1]  }
   0xa   :  { %v21_v2 = vld [vmem:[#allocation0] sm:$0x1]   ;;  %10 = vrot.lane.b32.xlu0 %v9_v1, %s65_s0 }
   0xb   :  { %22 = vrot.lane.b32.xlu1 %v21_v2, %s66_s8  ;;  %v15_v3 = vld [vmem:[#allocation0] sm:$0x1]  }
   0xc   :  { %v27_v4 = vld [vmem:[#allocation0] sm:$0x1]  }
   0xd   :  { %v6_v5 = vld [vmem:[#allocation0] sm:$0x1]  }
   0xe   :  { %8 = vst.msk [vmem:[%s118_s1] sm:$0x1] %vm7_vm0, %v6_v5   ;;  %16 = vrot.lane.b32.xlu0 %v15_v3, %s67_s11  ;;  %v33_v6 = vld [vmem:[#allocation0] sm:$0x1]  }
   0xf   :  { %28 = vrot.lane.b32.xlu1 %v27_v4, %s68_s12  ;;  %v39_v7 = vld [vmem:[#allocation0] sm:$0x1]  }
  0x10   :  { %v45_v8 = vld [vmem:[#allocation0] sm:$0x1]  }
  0x12   :  { %34 = vrot.lane.b32.xlu0 %v33_v6, %s69_s13 }
  0x13   :  { %40 = vrot.lane.b32.xlu1 %v39_v7, %s70_s14 }
  0x16   :  { %46 = vrot.lane.b32.xlu0 %v45_v8, %s71_s15 }
  0x7c   :  { %v11_v9 = vpop.permute.xlu0 %10  }
  0x7d   :  { %v23_v10 = vpop.permute.xlu1 %22   ;;  %51 = vst.msk [vmem:[%s118_s1 + $0x1] sm:$0x1] %vm7_vm0, %v11_v9  }
  0x7e   :  { %53 = vst.msk [vmem:[%s118_s1 + $0x3] sm:$0x1] %vm7_vm0, %v23_v10  }
  0x80   :  { %v17_v11 = vpop.permute.xlu0 %16  }
  0x81   :  { %v29_v12 = vpop.permute.xlu1 %28   ;;  %52 = vst.msk [vmem:[%s118_s1 + $0x2] sm:$0x1] %vm7_vm0, %v17_v11  }
  0x82   :  { %54 = vst.msk [vmem:[%s118_s1 + $0x4] sm:$0x1] %vm7_vm0, %v29_v12  }
  0x84   :  { %v35_v13 = vpop.permute.xlu0 %34  }
  0x85   :  { %v41_v14 = vpop.permute.xlu1 %40   ;;  %55 = vst.msk [vmem:[%s118_s1 + $0x5] sm:$0x1] %vm7_vm0, %v35_v13  }
  0x86   :  { %56 = vst.msk [vmem:[%s118_s1 + $0x6] sm:$0x1] %vm7_vm0, %v41_v14  }
  0x88   :  { %v47_v15 = vpop.permute.xlu0 %46  }
  0x89   :  { %57 = vst.msk [vmem:[%s118_s1 + $0x7] sm:$0x1] %vm7_vm0, %v47_v15  }

// kernel: vae_forward.1
= control target key start
LH: loop header
LB: loop body
LE: loop exit
PB: predicated region body
PF: predicated region fallthrough
CT: control target
= control target key end

     0   :  { %18 = vsyncpa [#allocation3], 0  ;;  %s4635_s0 = inlined_call_operand.vmem [shape: f32[64,16], index: 0, kind: input, shape index: {}]   ;;  %s4636_s1 = inlined_call_operand.hbm [shape: f32[16,512], index: 1, kind: input, shape index: {}]   ;;  %s4637_s2 = inlined_call_operand.hbm [shape: f32[128,512], index: 2, kind: input, shape index: {}]   ;;  %s4638_s3 = inlined_call_operand.hbm [shape: f32[1,512], index: 3, kind: input, shape index: {}]   ;;  %s4639_s4 = inlined_call_operand.vmem [shape: f32[128,128], index: 4, kind: input, shape index: {}]   ;;  %s4640_s5 = inlined_call_operand.hbm [shape: f32[1,128], index: 5, kind: input, shape index: {}]   ;;  %s4641_s6 = inlined_call_operand.vmem [shape: f32[128,256], index: 6, kind: input, shape index: {}]   ;;  %s4642_s7 = inlined_call_operand.vmem [shape: f32[1,256], index: 7, kind: input, shape index: {}]   ;;  %s4643_s8 = inlined_call_operand.hbm [shape: f32[128,128], index: 8, kind: input, shape index: {}]   ;;  %s4644_s9 = inlined_call_operand.hbm [shape: f32[1,128], index: 9, kind: input, shape index: {}]   ;;  %s4645_s10 = inlined_call_operand.vmem [shape: f32[128,128], index: 10, kind: input, shape index: {}]   ;;  %s4646_s11 = inlined_call_operand.hbm [shape: f32[1,128], index: 11, kind: input, shape index: {}]   ;;  %s4647_s12 = inlined_call_operand.vmem [shape: f32[64,128], index: 12, kind: input, shape index: {}]   ;;  %s4648_s13 = inlined_call_operand.vmem [shape: f32[64,384], index: 13, kind: output, shape index: {}]  }
   0x1   :  { %19 = vsyncpa [#allocation5], 0 }
   0x2   :  { %20 = vsyncpa [#allocation8], 0 }
   0x3   :  { %21 = vsyncpa [#allocation11], 0  ;;  %s3612_s25 = smov [#allocation4]   ;;  %s3613_s27 = smov [#allocation7]  }
   0x4   :  { %s41_s26 = sshll.u32 %s3612_s25, 4  ;;  %s66_s28 = sshll.u32 %s3613_s27, 4  ;;  %s42_s26 = int_to_ptr.vmem [resolvable:$true] %s41_s26  ;;  %s3694_s28 = int_to_ptr.vmem [resolvable:$true] %s66_s28 }
   0x5   :  { %s3450_s14 = scalar_lea.hbm %s4637_s2, 8192 }
   0x6   :  { %p3451_p0 = scmp.ne.s32.totalorder %s4637_s2, %s3450_s14  ;;  %p3454_p1 = scmp.lt.u32.totalorder %s3450_s14, %s4637_s2 }
   0x8   :  { %p3456_p2 = pnand %p3454_p1, %p3451_p0 }
   0xa   :  { %3459 = shalt.err (!%p3456_p2)
}
   0xb   :  { %s3460_s19 = scalar_lea.vmem %s42_s26, 8192  ;;  %p3465_p4 = scmp.lt.s32.totalorder %s42_s26, %s42_s26 }
   0xc   :  { %p3461_p3 = scmp.ne.s32.totalorder %s42_s26, %s3460_s19  ;;  %p3466_p5 = scmp.lt.s32.totalorder %s3460_s19, %s3460_s19 }
   0xe   :  { %p3467_p6 = por %p3466_p5, %p3465_p4 }
  0x10   :  { %p3468_p7 = pnand %p3467_p6, %p3461_p3 }
  0x12   :  { %3471 = shalt.err (!%p3468_p7)
}
  0x13   :  { %s3614_s20 = smov 512   ;;  %s3615_s21 = smov 32  }
  0x14   :  { %47 = dma.hbm_to_vmem [thread:$0]  %s4637_s2, 8192, %s42_s26, [#allocation5], %s3614_s20, %s3614_s20, %s3615_s21  }
  0x15   :  { %s3472_s27 = scalar_lea.hbm %s4640_s5, 16 }
  0x16   :  { %p3473_p8 = scmp.ne.s32.totalorder %s4640_s5, %s3472_s27  ;;  %p3476_p9 = scmp.lt.u32.totalorder %s3472_s27, %s4640_s5 }
  0x18   :  { %p3478_p10 = pnand %p3476_p9, %p3473_p8 }
  0x1a   :  { %3481 = shalt.err (!%p3478_p10)
}
  0x1b   :  { %s3482_s16 = scalar_lea.vmem %s3694_s28, 16  ;;  %s3486_s2 = scalar_lea.vmem %s3694_s28, 32 }
  0x1c   :  { %p3483_p11 = scmp.ne.s32.totalorder %s3694_s28, %s3482_s16  ;;  %p3487_p12 = scmp.lt.s32.totalorder %s3694_s28, %s3694_s28 }
  0x1d   :  { %p3488_p13 = scmp.lt.s32.totalorder %s3486_s2, %s3482_s16 }
  0x1f   :  { %p3489_p0 = por %p3488_p13, %p3487_p12 }
  0x21   :  { %p3490_p1 = pnand %p3489_p0, %p3483_p11 }
  0x23   :  { %3493 = shalt.err (!%p3490_p1)
}
  0x24   :  { %69 = dma.hbm_to_vmem [thread:$0]  %s4640_s5, 16, %s3694_s28, [#allocation8]  }
  0x25   :  { %s3616_s18 = smov [#allocation10]   ;;  %s3617_s22 = smov [#allocation2]  }
  0x26   :  { %s92_s19 = sshll.u32 %s3616_s18, 4  ;;  %s29_s23 = sshll.u32 %s3617_s22, 4  ;;  %s93_s19 = int_to_ptr.vmem [resolvable:$true] %s92_s19  ;;  %s3729_s23 = int_to_ptr.vmem [resolvable:$true] %s29_s23 }
  0x27   :  { %s3494_s27 = scalar_lea.hbm %s4644_s9, 16 }
  0x28   :  { %p3495_p2 = scmp.ne.s32.totalorder %s4644_s9, %s3494_s27  ;;  %p3498_p3 = scmp.lt.u32.totalorder %s3494_s27, %s4644_s9 }
  0x2a   :  { %p3500_p4 = pnand %p3498_p3, %p3495_p2 }
  0x2c   :  { %3503 = shalt.err (!%p3500_p4)
}
  0x2d   :  { %s3504_s5 = scalar_lea.vmem %s93_s19, 16  ;;  %s3508_s28 = scalar_lea.vmem %s93_s19, 32 }
  0x2e   :  { %p3505_p5 = scmp.ne.s32.totalorder %s93_s19, %s3504_s5  ;;  %p3509_p6 = scmp.lt.s32.totalorder %s93_s19, %s93_s19 }
  0x2f   :  { %p3510_p7 = scmp.lt.s32.totalorder %s3508_s28, %s3504_s5 }
  0x31   :  { %p3511_p8 = por %p3510_p7, %p3509_p6 }
  0x33   :  { %p3512_p9 = pnand %p3511_p8, %p3505_p5 }
  0x35   :  { %3515 = shalt.err (!%p3512_p9)
}
  0x36   :  { %95 = dma.hbm_to_vmem [thread:$0]  %s4644_s9, 16, %s93_s19, [#allocation11]  }
  0x37   :  { %s3516_s18 = scalar_lea.hbm %s4636_s1, 1024 }
  0x38   :  { %p3517_p10 = scmp.ne.s32.totalorder %s4636_s1, %s3516_s18  ;;  %p3520_p11 = scmp.lt.u32.totalorder %s3516_s18, %s4636_s1 }
  0x3a   :  { %p3522_p12 = pnand %p3520_p11, %p3517_p10 }
  0x3c   :  { %3525 = shalt.err (!%p3522_p12)
}
  0x3d   :  { %s3526_s29 = scalar_lea.vmem %s3729_s23, 1024  ;;  %p3531_p0 = scmp.lt.s32.totalorder %s3729_s23, %s3729_s23 }
  0x3e   :  { %p3527_p13 = scmp.ne.s32.totalorder %s3729_s23, %s3526_s29  ;;  %p3532_p1 = scmp.lt.s32.totalorder %s3526_s29, %s3526_s29 }
  0x40   :  { %p3533_p2 = por %p3532_p1, %p3531_p0 }
  0x42   :  { %p3534_p3 = pnand %p3533_p2, %p3527_p13 }
  0x44   :  { %3537 = shalt.err (!%p3534_p3)
}
  0x45   :  { %35 = dma.hbm_to_vmem [thread:$0]  %s4636_s1, 1024, %s3729_s23, [#allocation3], %s3614_s20, %s3614_s20, %s3615_s21  }
  0x46   :  { %s3618_s30 = smov [#allocation6]   ;;  %s3619_s15 = smov [#allocation9]  }
  0x47   :  { %s54_s14 = sshll.u32 %s3618_s30, 4  ;;  %s79_s5 = sshll.u32 %s3619_s15, 4  ;;  %s55_s14 = int_to_ptr.vmem [resolvable:$true] %s54_s14  ;;  %s3763_s5 = int_to_ptr.vmem [resolvable:$true] %s79_s5 }
  0x48   :  { %s3538_s2 = scalar_lea.hbm %s4638_s3, 64 }
  0x49   :  { %p3539_p4 = scmp.ne.s32.totalorder %s4638_s3, %s3538_s2  ;;  %p3542_p5 = scmp.lt.u32.totalorder %s3538_s2, %s4638_s3 }
  0x4b   :  { %p3544_p6 = pnand %p3542_p5, %p3539_p4 }
  0x4d   :  { %3547 = shalt.err (!%p3544_p6)
}
  0x4e   :  { %s3548_s1 = scalar_lea.vmem %s55_s14, 64  ;;  %p3553_p8 = scmp.lt.s32.totalorder %s55_s14, %s55_s14 }
  0x4f   :  { %p3549_p7 = scmp.ne.s32.totalorder %s55_s14, %s3548_s1  ;;  %p3554_p9 = scmp.lt.s32.totalorder %s3548_s1, %s3548_s1 }
  0x51   :  { %p3555_p10 = por %p3554_p9, %p3553_p8 }
  0x53   :  { %p3556_p11 = pnand %p3555_p10, %p3549_p7 }
  0x55   :  { %3559 = shalt.err (!%p3556_p11)
}
  0x56   :  { %57 = dma.hbm_to_vmem [thread:$0]  %s4638_s3, 64, %s55_s14, [#allocation5]  }
  0x57   :  { %s3560_s25 = scalar_lea.hbm %s4643_s8, 2048 }
  0x58   :  { %p3561_p12 = scmp.ne.s32.totalorder %s4643_s8, %s3560_s25  ;;  %p3564_p13 = scmp.lt.u32.totalorder %s3560_s25, %s4643_s8 }
  0x5a   :  { %p3566_p0 = pnand %p3564_p13, %p3561_p12 }
  0x5c   :  { %3569 = shalt.err (!%p3566_p0)
}
  0x5d   :  { %s3570_s30 = scalar_lea.vmem %s3763_s5, 2048  ;;  %p3575_p2 = scmp.lt.s32.totalorder %s3763_s5, %s3763_s5 }
  0x5e   :  { %p3571_p1 = scmp.ne.s32.totalorder %s3763_s5, %s3570_s30  ;;  %p3576_p3 = scmp.lt.s32.totalorder %s3570_s30, %s3570_s30 }
  0x60   :  { %p3577_p4 = por %p3576_p3, %p3575_p2 }
  0x62   :  { %p3578_p5 = pnand %p3577_p4, %p3571_p1 }
  0x64   :  { %3581 = shalt.err (!%p3578_p5)
}
  0x65   :  { %s3620_s3 = smov 128   ;;  %s3621_s14 = smov 8  }
  0x66   :  { %85 = dma.hbm_to_vmem [thread:$0]  %s4643_s8, 2048, %s3763_s5, [#allocation8], %s3620_s3, %s3620_s3, %s3621_s14  }
  0x67   :  { %s3622_s16 = smov [#allocation12]   ;;  %s3582_s18 = scalar_lea.hbm %s4646_s11, 16 }
  0x68   :  { %s104_s2 = sshll.u32 %s3622_s16, 4  ;;  %p3583_p6 = scmp.ne.s32.totalorder %s4646_s11, %s3582_s18  ;;  %s105_s2 = int_to_ptr.vmem [resolvable:$true] %s104_s2 }
  0x69   :  { %p3586_p7 = scmp.lt.u32.totalorder %s3582_s18, %s4646_s11 }
  0x6b   :  { %p3588_p8 = pnand %p3586_p7, %p3583_p6 }
  0x6d   :  { %3591 = shalt.err (!%p3588_p8)
}
  0x6e   :  { %s3592_s23 = scalar_lea.vmem %s105_s2, 16  ;;  %s3596_s8 = scalar_lea.vmem %s105_s2, 32 }
  0x6f   :  { %p3593_p9 = scmp.ne.s32.totalorder %s105_s2, %s3592_s23  ;;  %p3597_p10 = scmp.lt.s32.totalorder %s105_s2, %s105_s2 }
  0x70   :  { %p3598_p11 = scmp.lt.s32.totalorder %s3596_s8, %s3592_s23 }
  0x72   :  { %p3599_p12 = por %p3598_p11, %p3597_p10 }
  0x74   :  { %p3600_p13 = pnand %p3599_p12, %p3593_p9 }
  0x76   :  { %3603 = shalt.err (!%p3600_p13)
}
  0x77   :  { %107 = dma.hbm_to_vmem [thread:$0]  %s4646_s11, 16, %s105_s2, [#allocation11]  }
  0x78   :  { %3604 = dma.done.wait [#allocation3], 1024  }
  0x79   :  { %3605 = vsyncadd [#allocation3], 4294966272 }
  0x7a   :  { %3606 = dma.done.wait [#allocation5], 8256  }
  0x7b   :  { %3607 = vsyncadd [#allocation5], 4294959040 }
  0x7c   :  { %3608 = dma.done.wait [#allocation8], 2064  }
  0x7d   :  { %3609 = vsyncadd [#allocation8], 4294965232 }
  0x7e   :  { %3610 = dma.done.wait [#allocation11], 32  }
  0x7f   :  { %3611 = vsyncadd [#allocation11], 4294967264  ;;  %v3623_v0 = vmov 0.0   ;;  %v140_v1 = vld [vmem:[#allocation2 + $0x8] sm:$0xff]  ;;  %v139_v3 = vld [vmem:[#allocation2] sm:$0xff]  ;;  %vm169_vm0 = vcmask 130048  }
  0x80   :  { %258 = vmatprep.mubr.f32.mxu0 %v3623_v0  ;;  %371 = vmatprep.mubr.f32.mxu1 %v3623_v0  ;;  %v144_v2 = vld [vmem:[#allocation2 + $0x28] sm:$0xff]  ;;  %v143_v5 = vld [vmem:[#allocation2 + $0x20] sm:$0xff]  ;;  %v142_v6 = vld [vmem:[#allocation2 + $0x18] sm:$0xff] }
  0x81   :  { %v2654_v4 = vpack.c.bf16 %v144_v2, %v140_v1  ;;  %v2656_v7 = vpack.c.bf16 %v143_v5, %v139_v3  ;;  %v146_v8 = vld [vmem:[#allocation2 + $0x38] sm:$0xff]  ;;  %v141_v9 = vld [vmem:[#allocation2 + $0x10] sm:$0xff]  ;;  %v131_v13 = vld [vmem:[%s4635_s0] sm:$0xff] }
  0x82   :  { %v145_v10 = vld [vmem:[#allocation2 + $0x30] sm:$0xff]  ;;  %v2658_v11 = vpack.c.bf16 %v146_v8, %v142_v6  ;;  %v445_v14 = vld [vmem:[#allocation4 + $0x8] sm:$0xff]  ;;  %v447_v16 = vld [vmem:[#allocation4 + $0x18] sm:$0xff] }
  0x83   :  { %2655 = vmatprep.subr.bf16.mxu0 %v2654_v4  ;;  %v2660_v12 = vpack.c.bf16 %v145_v10, %v141_v9  ;;  %v449_v15 = vld [vmem:[#allocation4 + $0x28] sm:$0xff]  ;;  %v444_v18 = vld [vmem:[#allocation4] sm:$0xff]  ;;  %v451_v20 = vld [vmem:[#allocation4 + $0x38] sm:$0xff] }
  0x84   :  { %2657 = vmatpush1.bf16.msra.mxu0 %v2656_v7  ;;  %2659 = vmatprep.subr.bf16.mxu1 %v2658_v11  ;;  %v3815_v17 = vpack.c.bf16 %v449_v15, %v445_v14  ;;  %v448_v19 = vld [vmem:[#allocation4 + $0x20] sm:$0xff]  ;;  %v3819_v22 = vpack.c.bf16 %v451_v20, %v447_v16  ;;  %v446_v23 = vld [vmem:[#allocation4 + $0x10] sm:$0xff]  ;;  %v453_v26 = vld [vmem:[#allocation4 + $0x48] sm:$0xff] }
  0x85   :  { %2661 = vmatpush1.bf16.msra.mxu1 %v2660_v12  ;;  %v3817_v21 = vpack.c.bf16 %v448_v19, %v444_v18  ;;  %v450_v24 = vld [vmem:[#allocation4 + $0x30] sm:$0xff]  ;;  %v457_v27 = vld [vmem:[#allocation4 + $0x68] sm:$0xff]  ;;  %v455_v28 = vld [vmem:[#allocation4 + $0x58] sm:$0xff] }
  0x86   :  { %2663 = vmatprep.subr.bf16.mxu0 %v3815_v17  ;;  %v3822_v25 = vpack.c.bf16 %v450_v24, %v446_v23  ;;  %2695 = vmatprep.subr.bf16.mxu1 %v3819_v22  ;;  %v3827_v29 = vpack.c.bf16 %v457_v27, %v453_v26  ;;  %v452_v30 = vld [vmem:[#allocation4 + $0x40] sm:$0xff]  ;;  %v459_v32 = vld [vmem:[#allocation4 + $0x78] sm:$0xff]  ;;  %v132_v33 = vld [vmem:[%s4635_s0 + $0x8] sm:$0xff] }
  0x87   :  { %2399 = vmatmul.mubr.msk.f32.vlgmr.msra.gmra.mrb[0].mxu0 %vm169_vm0, %v131_v13  ;;  %v456_v31 = vld [vmem:[#allocation4 + $0x60] sm:$0xff]  ;;  %v3834_v35 = vpack.c.bf16 %v459_v32, %v455_v28  ;;  %v454_v36 = vld [vmem:[#allocation4 + $0x50] sm:$0xff]  ;;  %v461_v39 = vld [vmem:[#allocation4 + $0x88] sm:$0xff] }
  0x88   :  { %264 = vmatprep.mubr.f32.mxu0 %v3623_v0  ;;  %2407 = vmatmul.mubr.msk.f32.vlgmr.msra.gmra.mrb[0].mxu1 %vm169_vm0, %v131_v13  ;;  %v3832_v34 = vpack.c.bf16 %v456_v31, %v452_v30  ;;  %v458_v37 = vld [vmem:[#allocation4 + $0x70] sm:$0xff]  ;;  %v465_v40 = vld [vmem:[#allocation4 + $0xa8] sm:$0xff]  ;;  %v463_v41 = vld [vmem:[#allocation4 + $0x98] sm:$0xff] }
  0x89   :  { %377 = vmatprep.mubr.f32.mxu1 %v3623_v0  ;;  %2665 = vmatpush1.bf16.msra.mxu0 %v3817_v21  ;;  %v3838_v38 = vpack.c.bf16 %v458_v37, %v454_v36  ;;  %v3844_v42 = vpack.c.bf16 %v465_v40, %v461_v39  ;;  %v460_v43 = vld [vmem:[#allocation4 + $0x80] sm:$0xff]  ;;  %v467_v45 = vld [vmem:[#allocation4 + $0xb8] sm:$0xff]  ;;  %v133_v46 = vld [vmem:[%s4635_s0 + $0x10] sm:$0xff] }
  0x8a   :  { %2697 = vmatpush1.bf16.msra.mxu1 %v3822_v25  ;;  %2667 = vmatprep.subr.bf16.mxu0 %v3827_v29  ;;  %v464_v44 = vld [vmem:[#allocation4 + $0xa0] sm:$0xff]  ;;  %v3853_v48 = vpack.c.bf16 %v467_v45, %v463_v41  ;;  %v462_v49 = vld [vmem:[#allocation4 + $0x90] sm:$0xff]  ;;  %v469_v52 = vld [vmem:[#allocation4 + $0xc8] sm:$0xff] }
  0x8b   :  { %2400 = vmatmul.mubr.msk.f32.gmra.mrb[2].mxu0 %vm169_vm0, %v132_v33  ;;  %2699 = vmatprep.subr.bf16.mxu1 %v3834_v35  ;;  %v3851_v47 = vpack.c.bf16 %v464_v44, %v460_v43  ;;  %v466_v50 = vld [vmem:[#allocation4 + $0xb0] sm:$0xff]  ;;  %v473_v53 = vld [vmem:[#allocation4 + $0xe8] sm:$0xff]  ;;  %v471_v54 = vld [vmem:[#allocation4 + $0xd8] sm:$0xff] }
  0x8c   :  { %2408 = vmatmul.mubr.msk.f32.gmra.mrb[2].mxu1 %vm169_vm0, %v132_v33  ;;  %270 = vmatprep.mubr.f32.mxu0 %v3623_v0  ;;  %v3857_v51 = vpack.c.bf16 %v466_v50, %v462_v49  ;;  %v3863_v55 = vpack.c.bf16 %v473_v53, %v469_v52  ;;  %v468_v56 = vld [vmem:[#allocation4 + $0xc0] sm:$0xff]  ;;  %v475_v58 = vld [vmem:[#allocation4 + $0xf8] sm:$0xff]  ;;  %v470_v62 = vld [vmem:[#allocation4 + $0xd0] sm:$0xff] }
  0x8d   :  { %2669 = vmatpush1.bf16.msra.mxu0 %v3832_v34  ;;  %383 = vmatprep.mubr.f32.mxu1 %v3623_v0  ;;  %v472_v57 = vld [vmem:[#allocation4 + $0xe0] sm:$0xff]  ;;  %v134_v59 = vld [vmem:[%s4635_s0 + $0x18] sm:$0xff]  ;;  %v3872_v61 = vpack.c.bf16 %v475_v58, %v471_v54  ;;  %v474_v63 = vld [vmem:[#allocation4 + $0xf0] sm:$0xff] }
  0x8e   :  { %2701 = vmatpush1.bf16.msra.mxu1 %v3838_v38  ;;  %2671 = vmatprep.subr.bf16.mxu0 %v3844_v42  ;;  %v3870_v60 = vpack.c.bf16 %v472_v57, %v468_v56  ;;  %v3876_v1 = vpack.c.bf16 %v474_v63, %v470_v62  ;;  %v477_v2 = vld [vmem:[#allocation4 + $0x108] sm:$0xff]  ;;  %v479_v4 = vld [vmem:[#allocation4 + $0x118] sm:$0xff]  ;;  %v476_v6 = vld [vmem:[#allocation4 + $0x100] sm:$0xff] }
  0x8f   :  { %2401 = vmatmul.mubr.msk.f32.gmra.mrb[4].mxu0 %vm169_vm0, %v133_v46  ;;  %2703 = vmatprep.subr.bf16.mxu1 %v3853_v48  ;;  %v481_v3 = vld [vmem:[#allocation4 + $0x128] sm:$0xff]  ;;  %v480_v7 = vld [vmem:[#allocation4 + $0x120] sm:$0xff]  ;;  %v483_v8 = vld [vmem:[#allocation4 + $0x138] sm:$0xff] }
  0x90   :  { %2409 = vmatmul.mubr.msk.f32.gmra.mrb[4].mxu1 %vm169_vm0, %v133_v46  ;;  %276 = vmatprep.mubr.f32.mxu0 %v3623_v0  ;;  %v3882_v5 = vpack.c.bf16 %v481_v3, %v477_v2  ;;  %v135_v9 = vld [vmem:[%s4635_s0 + $0x20] sm:$0xff]  ;;  %v3889_v10 = vpack.c.bf16 %v480_v7, %v476_v6  ;;  %v3891_v11 = vpack.c.bf16 %v483_v8, %v479_v4  ;;  %v478_v12 = vld [vmem:[#allocation4 + $0x110] sm:$0xff]  ;;  %v485_v15 = vld [vmem:[#allocation4 + $0x148] sm:$0xff]  ;;  %v149_v8 = vlaneseq }
  0x91   :  { %2673 = vmatpush1.bf16.msra.mxu0 %v3851_v47  ;;  %389 = vmatprep.mubr.f32.mxu1 %v3623_v0  ;;  %v482_v13 = vld [vmem:[#allocation4 + $0x130] sm:$0xff]  ;;  %v489_v16 = vld [vmem:[#allocation4 + $0x168] sm:$0xff]  ;;  %v487_v18 = vld [vmem:[#allocation4 + $0x158] sm:$0xff] }
  0x92   :  { %2705 = vmatpush1.bf16.msra.mxu1 %v3857_v51  ;;  %2675 = vmatprep.subr.bf16.mxu0 %v3863_v55  ;;  %v3895_v14 = vpack.c.bf16 %v482_v13, %v478_v12  ;;  %v3901_v19 = vpack.c.bf16 %v489_v16, %v485_v15  ;;  %v484_v20 = vld [vmem:[#allocation4 + $0x140] sm:$0xff]  ;;  %v491_v24 = vld [vmem:[#allocation4 + $0x178] sm:$0xff]  ;;  %v136_v26 = vld [vmem:[%s4635_s0 + $0x28] sm:$0xff] }
  0x93   :  { %2402 = vmatmul.mubr.msk.f32.gmra.mrb[6].mxu0 %vm169_vm0, %v134_v59  ;;  %2707 = vmatprep.subr.bf16.mxu1 %v3872_v61  ;;  %v488_v23 = vld [vmem:[#allocation4 + $0x160] sm:$0xff]  ;;  %v3910_v28 = vpack.c.bf16 %v491_v24, %v487_v18  ;;  %v486_v30 = vld [vmem:[#allocation4 + $0x150] sm:$0xff]  ;;  %v493_v33 = vld [vmem:[#allocation4 + $0x188] sm:$0xff] }
  0x94   :  { %2410 = vmatmul.mubr.msk.f32.gmra.mrb[6].mxu1 %vm169_vm0, %v134_v59  ;;  %282 = vmatprep.mubr.f32.mxu0 %v3623_v0  ;;  %v3908_v27 = vpack.c.bf16 %v488_v23, %v484_v20  ;;  %v490_v31 = vld [vmem:[#allocation4 + $0x170] sm:$0xff]  ;;  %v497_v36 = vld [vmem:[#allocation4 + $0x1a8] sm:$0xff]  ;;  %v492_v40 = vld [vmem:[#allocation4 + $0x180] sm:$0xff] }
  0x95   :  { %2677 = vmatpush1.bf16.msra.mxu0 %v3870_v60  ;;  %395 = vmatprep.mubr.f32.mxu1 %v3623_v0  ;;  %v3914_v32 = vpack.c.bf16 %v490_v31, %v486_v30  ;;  %v137_v37 = vld [vmem:[%s4635_s0 + $0x30] sm:$0xff]  ;;  %v3921_v39 = vpack.c.bf16 %v497_v36, %v493_v33  ;;  %v496_v41 = vld [vmem:[#allocation4 + $0x1a0] sm:$0xff]  ;;  %v495_v43 = vld [vmem:[#allocation4 + $0x198] sm:$0xff] }
  0x96   :  { %2709 = vmatpush1.bf16.msra.mxu1 %v3876_v1  ;;  %2679 = vmatprep.subr.bf16.mxu0 %v3882_v5  ;;  %v3925_v44 = vpack.c.bf16 %v496_v41, %v492_v40  ;;  %v499_v45 = vld [vmem:[#allocation4 + $0x1b8] sm:$0xff]  ;;  %v494_v46 = vld [vmem:[#allocation4 + $0x190] sm:$0xff]  ;;  %v501_v53 = vld [vmem:[#allocation4 + $0x1c8] sm:$0xff] }
  0x97   :  { %2403 = vmatmul.mubr.msk.f32.gmra.mrb[8].mxu0 %vm169_vm0, %v135_v9  ;;  %2711 = vmatprep.subr.bf16.mxu1 %v3891_v11  ;;  %v498_v49 = vld [vmem:[#allocation4 + $0x1b0] sm:$0xff]  ;;  %v3929_v50 = vpack.c.bf16 %v499_v45, %v495_v43  ;;  %v505_v54 = vld [vmem:[#allocation4 + $0x1e8] sm:$0xff]  ;;  %v138_v56 = vld [vmem:[%s4635_s0 + $0x38] sm:$0xff] }
  0x98   :  { %2411 = vmatmul.mubr.msk.f32.gmra.mrb[8].mxu1 %vm169_vm0, %v135_v9  ;;  %288 = vmatprep.mubr.f32.mxu0 %v3623_v0  ;;  %v3931_v52 = vpack.c.bf16 %v498_v49, %v494_v46  ;;  %v3938_v57 = vpack.c.bf16 %v505_v54, %v501_v53  ;;  %v500_v58 = vld [vmem:[#allocation4 + $0x1c0] sm:$0xff]  ;;  %v503_v62 = vld [vmem:[#allocation4 + $0x1d8] sm:$0xff]  ;;  %v502_v3 = vld [vmem:[#allocation4 + $0x1d0] sm:$0xff]  ;;  %v3962_v9 = vshrl.u32 %v149_v8, 7 }
  0x99   :  { %2681 = vmatpush1.bf16.msra.mxu0 %v3889_v10  ;;  %401 = vmatprep.mubr.f32.mxu1 %v3623_v0  ;;  %v504_v59 = vld [vmem:[#allocation4 + $0x1e0] sm:$0xff]  ;;  %v507_v2 = vld [vmem:[#allocation4 + $0x1f8] sm:$0xff]  ;;  %v506_v4 = vld [vmem:[#allocation4 + $0x1f0] sm:$0xff] }
  0x9a   :  { %2713 = vmatpush1.bf16.msra.mxu1 %v3895_v14  ;;  %2683 = vmatprep.subr.bf16.mxu0 %v3901_v19  ;;  %v3942_v63 = vpack.c.bf16 %v504_v59, %v500_v58  ;;  %v3946_v6 = vpack.c.bf16 %v507_v2, %v503_v62  ;;  %v3950_v7 = vpack.c.bf16 %v506_v4, %v502_v3  ;;  %v151_v12 = vsub.s32 0, %v3962_v9  ;;  %v147_v13 = vld [vmem:[#allocation6] sm:$0xf] }
  0x9b   :  { %2404 = vmatmul.mubr.msk.f32.gmra.mrb[10].mxu0 %vm169_vm0, %v136_v26  ;;  %2715 = vmatprep.subr.bf16.mxu1 %v3910_v28  ;;  %v155_v15 = vsub.s32 1, %v3962_v9  ;;  %v163_v20 = vsub.s32 3, %v3962_v9  ;;  %v159_v41 = vsub.s32 2, %v3962_v9 }
  0x9c   :  { %2412 = vmatmul.mubr.msk.f32.gmra.mrb[10].mxu1 %vm169_vm0, %v136_v26  ;;  %294 = vmatprep.mubr.f32.mxu0 %v3623_v0  ;;  %v3968_v16 = vrot.slane %v147_v13, %v151_v12 }
  0x9d   :  { %2685 = vmatpush1.bf16.msra.mxu0 %v3908_v27  ;;  %407 = vmatprep.mubr.f32.mxu1 %v3623_v0  ;;  %v3972_v18 = vrot.slane %v147_v13, %v155_v15  ;;  %v3977_v36 = vrot.slane %v147_v13, %v163_v20  ;;  %v3981_v45 = vrot.slane %v147_v13, %v159_v41 }
  0x9e   :  { %2717 = vmatpush1.bf16.msra.mxu1 %v3914_v32  ;;  %2687 = vmatprep.subr.bf16.mxu0 %v3921_v39 }
  0x9f   :  { %2405 = vmatmul.mubr.msk.f32.gmra.mrb[12].mxu0 %vm169_vm0, %v137_v37  ;;  %2719 = vmatprep.subr.bf16.mxu1 %v3929_v50 }
  0xa0   :  { %2413 = vmatmul.mubr.msk.f32.gmra.mrb[12].mxu1 %vm169_vm0, %v137_v37  ;;  %300 = vmatprep.mubr.f32.mxu0 %v3623_v0 }
  0xa1   :  { %2689 = vmatpush1.bf16.msra.mxu0 %v3925_v44  ;;  %413 = vmatprep.mubr.f32.mxu1 %v3623_v0 }
  0xa2   :  { %2721 = vmatpush1.bf16.msra.mxu1 %v3931_v52  ;;  %2691 = vmatprep.subr.bf16.mxu0 %v3938_v57 }
  0xa3   :  { %2406 = vmatmul.mubr.msk.f32.gmra.mrb[14].mxu0 %vm169_vm0, %v138_v56  ;;  %2723 = vmatprep.subr.bf16.mxu1 %v3946_v6 }
  0xa4   :  { %2414 = vmatmul.mubr.msk.f32.gmra.mrb[14].mxu1 %vm169_vm0, %v138_v56  ;;  %572 = vmatprep.mubr.f32.mxu0 %v3623_v0 }
  0xa5   :  { %2693 = vmatpush1.bf16.msra.mxu0 %v3942_v63  ;;  %643 = vmatprep.mubr.f32.mxu1 %v3623_v0 }
  0xa6   :  { %2725 = vmatpush1.bf16.msra.mxu1 %v3950_v7  ;;  %2727 = vmatprep.subr.bf16.mxu0 %v3815_v17 }
  0xa7   :  { %2759 = vmatprep.subr.bf16.mxu1 %v3819_v22 }
 0x15a   :  { %v260_v23 = vpop.f32.mrb[0].mxu0 }
 0x15b   :  { %v261_v24 = vadd.f32 %v260_v23, %v3968_v16  ;;  %v262_v26 = vpop.f32.mrb[1].mxu0  ;;  %v373_v31 = vpop.f32.mrb[0].mxu1 }
 0x15c   :  { %v263_v30 = vadd.f32 %v262_v26, %v3972_v18  ;;  %v375_v37 = vpop.f32.mrb[1].mxu1  ;;  %v374_v49 = vadd.f32 %v373_v31, %v3981_v45 }
 0x15d   :  { %v2415_v33 = vmul.f32 -1.442695, %v261_v24  ;;  %v376_v43 = vadd.f32 %v375_v37, %v3977_v36 }
 0x15e   :  { %v2416_v40 = vmul.f32 -1.442695, %v263_v30 }
 0x15f   :  { %3306 = vpow2.f32 %v2415_v33  ;;  %v2417_v46 = vmul.f32 -1.442695, %v376_v43 }
 0x160   :  { %3308 = vpow2.f32 %v2416_v40 }
 0x161   :  { %3310 = vpow2.f32 %v2417_v46 }
 0x162   :  { %3312 = vtanh.f32 %v374_v49 }
 0x169   :  { %v3307_v53 = vpop.eup %3306 }
 0x16a   :  { %v3309_v54 = vpop.eup %3308  ;;  %v423_v56 = vadd.f32 1.0, %v3307_v53 }
 0x16b   :  { %v429_v58 = vadd.f32 1.0, %v3309_v54  ;;  %v3311_v59 = vpop.eup %3310 }
 0x16c   :  { %3314 = vrcp.f32 %v423_v56  ;;  %v3313_v62 = vpop.eup %3312  ;;  %v436_v3 = vadd.f32 1.0, %v3311_v59 }
 0x16d   :  { %3316 = vrcp.f32 %v429_v58 }
 0x16e   :  { %3318 = vrcp.f32 %v436_v3 }
 0x176   :  { %v3315_v2 = vpop.eup %3314 }
 0x177   :  { %v3317_v4 = vpop.eup %3316  ;;  %v440_v8 = vmul.f32 %v3315_v2, %v3313_v62 }
 0x178   :  { %v439_v20 = vmul.f32 0.0, %v3317_v4  ;;  %v3319_v23 = vpop.eup %3318 }
 0x17a   :  { %v3984_v13 = vadd.f32 %v440_v8, %v439_v20 }
 0x17c   :  { %3320 = vtanh.f32 %v3984_v13 }
 0x186   :  { %v3321_v24 = vpop.eup %3320 }
 0x187   :  { %v3987_v26 = vmul.f32 %v3321_v24, %v3319_v23 }
 0x189   :  { %573 = vmatmul.mubr.f32.vlgmr.msra.gmra.mrb[2].mxu0 %v3987_v26  ;;  %644 = vmatmul.mubr.f32.vlgmr.msra.gmra.mrb[2].mxu1 %v3987_v26 }
 0x18a   :  { %2729 = vmatpush1.bf16.msra.mxu0 %v3817_v21  ;;  %2761 = vmatpush1.bf16.msra.mxu1 %v3822_v25 }
 0x18b   :  { %2731 = vmatprep.subr.bf16.mxu0 %v3827_v29  ;;  %2763 = vmatprep.subr.bf16.mxu1 %v3834_v35 }
 0x18c   :  { %742 = vmatprep.mubr.f32.mxu0 %v3623_v0  ;;  %813 = vmatprep.mubr.f32.mxu1 %v3623_v0 }
 0x18e   :  { %2733 = vmatpush1.bf16.msra.mxu0 %v3832_v34  ;;  %2765 = vmatpush1.bf16.msra.mxu1 %v3838_v38 }
 0x18f   :  { %2735 = vmatprep.subr.bf16.mxu0 %v3844_v42  ;;  %2767 = vmatprep.subr.bf16.mxu1 %v3853_v48 }
 0x192   :  { %2737 = vmatpush1.bf16.msra.mxu0 %v3851_v47  ;;  %2769 = vmatpush1.bf16.msra.mxu1 %v3857_v51 }
 0x193   :  { %2739 = vmatprep.subr.bf16.mxu0 %v3863_v55  ;;  %2771 = vmatprep.subr.bf16.mxu1 %v3872_v61 }
 0x196   :  { %2741 = vmatpush1.bf16.msra.mxu0 %v3870_v60  ;;  %2773 = vmatpush1.bf16.msra.mxu1 %v3876_v1 }
 0x197   :  { %2743 = vmatprep.subr.bf16.mxu0 %v3882_v5  ;;  %2775 = vmatprep.subr.bf16.mxu1 %v3891_v11 }
 0x19a   :  { %2745 = vmatpush1.bf16.msra.mxu0 %v3889_v10  ;;  %2777 = vmatpush1.bf16.msra.mxu1 %v3895_v14 }
 0x19b   :  { %2747 = vmatprep.subr.bf16.mxu0 %v3901_v19  ;;  %2779 = vmatprep.subr.bf16.mxu1 %v3910_v28 }
 0x19e   :  { %2749 = vmatpush1.bf16.msra.mxu0 %v3908_v27  ;;  %2781 = vmatpush1.bf16.msra.mxu1 %v3914_v32 }
 0x19f   :  { %2751 = vmatprep.subr.bf16.mxu0 %v3921_v39  ;;  %2783 = vmatprep.subr.bf16.mxu1 %v3929_v50 }
 0x1a2   :  { %2753 = vmatpush1.bf16.msra.mxu0 %v3925_v44  ;;  %2785 = vmatpush1.bf16.msra.mxu1 %v3931_v52 }
 0x1a3   :  { %2755 = vmatprep.subr.bf16.mxu0 %v3938_v57  ;;  %2787 = vmatprep.subr.bf16.mxu1 %v3946_v6 }
 0x1a6   :  { %2757 = vmatpush1.bf16.msra.mxu0 %v3942_v63  ;;  %2789 = vmatpush1.bf16.msra.mxu1 %v3950_v7 }
 0x1a7   :  { %2791 = vmatprep.subr.bf16.mxu0 %v3815_v17  ;;  %2823 = vmatprep.subr.bf16.mxu1 %v3819_v22 }
 0x25c   :  { %v574_v30 = vpop.f32.mrb[2].mxu0  ;;  %v645_v31 = vpop.f32.mrb[2].mxu1 }
 0x25d   :  { %v3238_v33 = vadd.f32 %v574_v30, %v3968_v16  ;;  %v576_v37 = vpop.f32.mrb[3].mxu0  ;;  %v647_v40 = vpop.f32.mrb[3].mxu1  ;;  %v3252_v54 = vadd.f32 %v645_v31, %v3981_v45 }
 0x25e   :  { %v3239_v41 = vadd.f32 %v576_v37, %v3972_v18  ;;  %v3253_v49 = vadd.f32 %v647_v40, %v3977_v36 }
 0x25f   :  { %v2418_v43 = vmul.f32 -1.442695, %v3238_v33 }
 0x260   :  { %v2419_v46 = vmul.f32 -1.442695, %v3239_v41  ;;  %v2420_v53 = vmul.f32 -1.442695, %v3253_v49 }
 0x261   :  { %3322 = vpow2.f32 %v2418_v43 }
 0x262   :  { %3324 = vpow2.f32 %v2419_v46 }
 0x263   :  { %3326 = vpow2.f32 %v2420_v53 }
 0x264   :  { %3328 = vtanh.f32 %v3252_v54 }
 0x26b   :  { %v3323_v56 = vpop.eup %3322 }
 0x26c   :  { %v3325_v58 = vpop.eup %3324  ;;  %v657_v59 = vadd.f32 1.0, %v3323_v56 }
 0x26d   :  { %v663_v62 = vadd.f32 1.0, %v3325_v58  ;;  %v3327_v2 = vpop.eup %3326 }
 0x26e   :  { %3330 = vrcp.f32 %v657_v59  ;;  %v3329_v3 = vpop.eup %3328  ;;  %v670_v23 = vadd.f32 1.0, %v3327_v2 }
 0x26f   :  { %3332 = vrcp.f32 %v663_v62 }
 0x270   :  { %3334 = vrcp.f32 %v670_v23 }
 0x278   :  { %v3331_v4 = vpop.eup %3330 }
 0x279   :  { %v3333_v8 = vpop.eup %3332  ;;  %v674_v20 = vmul.f32 %v3331_v4, %v3329_v3 }
 0x27a   :  { %v673_v24 = vmul.f32 %v3333_v8, %v3984_v13  ;;  %v3335_v31 = vpop.eup %3334 }
 0x27c   :  { %v4030_v30 = vadd.f32 %v674_v20, %v673_v24 }
 0x27e   :  { %3336 = vtanh.f32 %v4030_v30 }
 0x288   :  { %v3337_v33 = vpop.eup %3336 }
 0x289   :  { %v4033_v37 = vmul.f32 %v3337_v33, %v3335_v31 }
 0x28b   :  { %743 = vmatmul.mubr.f32.vlgmr.msra.gmra.mrb[4].mxu0 %v4033_v37  ;;  %814 = vmatmul.mubr.f32.vlgmr.msra.gmra.mrb[4].mxu1 %v4033_v37 }
 0x28c   :  { %2793 = vmatpush1.bf16.msra.mxu0 %v3817_v21  ;;  %2825 = vmatpush1.bf16.msra.mxu1 %v3822_v25 }
 0x28d   :  { %2795 = vmatprep.subr.bf16.mxu0 %v3827_v29  ;;  %2827 = vmatprep.subr.bf16.mxu1 %v3834_v35 }
 0x28e   :  { %912 = vmatprep.mubr.f32.mxu0 %v3623_v0  ;;  %983 = vmatprep.mubr.f32.mxu1 %v3623_v0 }
 0x290   :  { %2797 = vmatpush1.bf16.msra.mxu0 %v3832_v34  ;;  %2829 = vmatpush1.bf16.msra.mxu1 %v3838_v38 }
 0x291   :  { %2799 = vmatprep.subr.bf16.mxu0 %v3844_v42  ;;  %2831 = vmatprep.subr.bf16.mxu1 %v3853_v48 }
 0x294   :  { %2801 = vmatpush1.bf16.msra.mxu0 %v3851_v47  ;;  %2833 = vmatpush1.bf16.msra.mxu1 %v3857_v51 }
 0x295   :  { %2803 = vmatprep.subr.bf16.mxu0 %v3863_v55  ;;  %2835 = vmatprep.subr.bf16.mxu1 %v3872_v61 }
 0x298   :  { %2805 = vmatpush1.bf16.msra.mxu0 %v3870_v60  ;;  %2837 = vmatpush1.bf16.msra.mxu1 %v3876_v1 }
 0x299   :  { %2807 = vmatprep.subr.bf16.mxu0 %v3882_v5  ;;  %2839 = vmatprep.subr.bf16.mxu1 %v3891_v11 }
 0x29c   :  { %2809 = vmatpush1.bf16.msra.mxu0 %v3889_v10  ;;  %2841 = vmatpush1.bf16.msra.mxu1 %v3895_v14 }
 0x29d   :  { %2811 = vmatprep.subr.bf16.mxu0 %v3901_v19  ;;  %2843 = vmatprep.subr.bf16.mxu1 %v3910_v28 }
 0x2a0   :  { %2813 = vmatpush1.bf16.msra.mxu0 %v3908_v27  ;;  %2845 = vmatpush1.bf16.msra.mxu1 %v3914_v32 }
 0x2a1   :  { %2815 = vmatprep.subr.bf16.mxu0 %v3921_v39  ;;  %2847 = vmatprep.subr.bf16.mxu1 %v3929_v50 }
 0x2a4   :  { %2817 = vmatpush1.bf16.msra.mxu0 %v3925_v44  ;;  %2849 = vmatpush1.bf16.msra.mxu1 %v3931_v52 }
 0x2a5   :  { %2819 = vmatprep.subr.bf16.mxu0 %v3938_v57  ;;  %2851 = vmatprep.subr.bf16.mxu1 %v3946_v6 }
 0x2a8   :  { %2821 = vmatpush1.bf16.msra.mxu0 %v3942_v63  ;;  %2853 = vmatpush1.bf16.msra.mxu1 %v3950_v7 }
 0x2a9   :  { %2855 = vmatprep.subr.bf16.mxu0 %v3815_v17  ;;  %2887 = vmatprep.subr.bf16.mxu1 %v3819_v22 }
 0x35e   :  { %v744_v13 = vpop.f32.mrb[4].mxu0  ;;  %v815_v40 = vpop.f32.mrb[4].mxu1 }
 0x35f   :  { %v3240_v41 = vadd.f32 %v744_v13, %v3968_v16  ;;  %v746_v43 = vpop.f32.mrb[5].mxu0  ;;  %v817_v46 = vpop.f32.mrb[5].mxu1  ;;  %v3254_v59 = vadd.f32 %v815_v40, %v3981_v45 }
 0x360   :  { %v3241_v49 = vadd.f32 %v746_v43, %v3972_v18  ;;  %v3255_v56 = vadd.f32 %v817_v46, %v3977_v36 }
 0x361   :  { %v2421_v53 = vmul.f32 -1.442695, %v3240_v41 }
 0x362   :  { %v2422_v54 = vmul.f32 -1.442695, %v3241_v49  ;;  %v2423_v58 = vmul.f32 -1.442695, %v3255_v56 }
 0x363   :  { %3338 = vpow2.f32 %v2421_v53 }
 0x364   :  { %3340 = vpow2.f32 %v2422_v54 }
 0x365   :  { %3342 = vpow2.f32 %v2423_v58 }
 0x366   :  { %3344 = vtanh.f32 %v3254_v59 }
 0x36d   :  { %v3339_v62 = vpop.eup %3338 }
 0x36e   :  { %v3341_v2 = vpop.eup %3340  ;;  %v827_v3 = vadd.f32 1.0, %v3339_v62 }
 0x36f   :  { %v833_v4 = vadd.f32 1.0, %v3341_v2  ;;  %v3343_v8 = vpop.eup %3342 }
 0x370   :  { %3346 = vrcp.f32 %v827_v3  ;;  %v3345_v20 = vpop.eup %3344  ;;  %v840_v33 = vadd.f32 1.0, %v3343_v8 }
 0x371   :  { %3348 = vrcp.f32 %v833_v4 }
 0x372   :  { %3350 = vrcp.f32 %v840_v33 }
 0x37a   :  { %v3347_v23 = vpop.eup %3346 }
 0x37b   :  { %v3349_v24 = vpop.eup %3348  ;;  %v844_v31 = vmul.f32 %v3347_v23, %v3345_v20 }
 0x37c   :  { %v843_v13 = vmul.f32 %v3349_v24, %v4030_v30  ;;  %v3351_v40 = vpop.eup %3350 }
 0x37e   :  { %v4076_v41 = vadd.f32 %v844_v31, %v843_v13 }
 0x380   :  { %3352 = vtanh.f32 %v4076_v41 }
 0x38a   :  { %v3353_v43 = vpop.eup %3352 }
 0x38b   :  { %v4079_v46 = vmul.f32 %v3353_v43, %v3351_v40 }
 0x38d   :  { %913 = vmatmul.mubr.f32.vlgmr.msra.gmra.mrb[6].mxu0 %v4079_v46  ;;  %984 = vmatmul.mubr.f32.vlgmr.msra.gmra.mrb[6].mxu1 %v4079_v46 }
 0x38e   :  { %2857 = vmatpush1.bf16.msra.mxu0 %v3817_v21  ;;  %2889 = vmatpush1.bf16.msra.mxu1 %v3822_v25 }
 0x38f   :  { %2859 = vmatprep.subr.bf16.mxu0 %v3827_v29  ;;  %2891 = vmatprep.subr.bf16.mxu1 %v3834_v35 }
 0x390   :  { %1082 = vmatprep.mubr.f32.mxu0 %v3623_v0  ;;  %1153 = vmatprep.mubr.f32.mxu1 %v3623_v0 }
 0x392   :  { %2861 = vmatpush1.bf16.msra.mxu0 %v3832_v34  ;;  %2893 = vmatpush1.bf16.msra.mxu1 %v3838_v38 }
 0x393   :  { %2863 = vmatprep.subr.bf16.mxu0 %v3844_v42  ;;  %2895 = vmatprep.subr.bf16.mxu1 %v3853_v48 }
 0x396   :  { %2865 = vmatpush1.bf16.msra.mxu0 %v3851_v47  ;;  %2897 = vmatpush1.bf16.msra.mxu1 %v3857_v51 }
 0x397   :  { %2867 = vmatprep.subr.bf16.mxu0 %v3863_v55  ;;  %2899 = vmatprep.subr.bf16.mxu1 %v3872_v61 }
 0x39a   :  { %2869 = vmatpush1.bf16.msra.mxu0 %v3870_v60  ;;  %2901 = vmatpush1.bf16.msra.mxu1 %v3876_v1 }
 0x39b   :  { %2871 = vmatprep.subr.bf16.mxu0 %v3882_v5  ;;  %2903 = vmatprep.subr.bf16.mxu1 %v3891_v11 }
 0x39e   :  { %2873 = vmatpush1.bf16.msra.mxu0 %v3889_v10  ;;  %2905 = vmatpush1.bf16.msra.mxu1 %v3895_v14 }
 0x39f   :  { %2875 = vmatprep.subr.bf16.mxu0 %v3901_v19  ;;  %2907 = vmatprep.subr.bf16.mxu1 %v3910_v28 }
 0x3a2   :  { %2877 = vmatpush1.bf16.msra.mxu0 %v3908_v27  ;;  %2909 = vmatpush1.bf16.msra.mxu1 %v3914_v32 }
 0x3a3   :  { %2879 = vmatprep.subr.bf16.mxu0 %v3921_v39  ;;  %2911 = vmatprep.subr.bf16.mxu1 %v3929_v50 }
 0x3a6   :  { %2881 = vmatpush1.bf16.msra.mxu0 %v3925_v44  ;;  %2913 = vmatpush1.bf16.msra.mxu1 %v3931_v52 }
 0x3a7   :  { %2883 = vmatprep.subr.bf16.mxu0 %v3938_v57  ;;  %2915 = vmatprep.subr.bf16.mxu1 %v3946_v6 }
 0x3aa   :  { %2885 = vmatpush1.bf16.msra.mxu0 %v3942_v63  ;;  %2917 = vmatpush1.bf16.msra.mxu1 %v3950_v7 }
 0x3ab   :  { %2919 = vmatprep.subr.bf16.mxu0 %v3815_v17  ;;  %2951 = vmatprep.subr.bf16.mxu1 %v3819_v22 }
 0x460   :  { %v914_v30 = vpop.f32.mrb[6].mxu0  ;;  %v985_v49 = vpop.f32.mrb[6].mxu1 }
 0x461   :  { %v3242_v53 = vadd.f32 %v914_v30, %v3968_v16  ;;  %v916_v54 = vpop.f32.mrb[7].mxu0  ;;  %v987_v56 = vpop.f32.mrb[7].mxu1  ;;  %v3256_v4 = vadd.f32 %v985_v49, %v3981_v45 }
 0x462   :  { %v3243_v58 = vadd.f32 %v916_v54, %v3972_v18  ;;  %v3257_v2 = vadd.f32 %v987_v56, %v3977_v36 }
 0x463   :  { %v2424_v59 = vmul.f32 -1.442695, %v3242_v53 }
 0x464   :  { %v2425_v62 = vmul.f32 -1.442695, %v3243_v58  ;;  %v2426_v3 = vmul.f32 -1.442695, %v3257_v2 }
 0x465   :  { %3354 = vpow2.f32 %v2424_v59 }
 0x466   :  { %3356 = vpow2.f32 %v2425_v62 }
 0x467   :  { %3358 = vpow2.f32 %v2426_v3 }
 0x468   :  { %3360 = vtanh.f32 %v3256_v4 }
 0x46f   :  { %v3355_v8 = vpop.eup %3354 }
 0x470   :  { %v3357_v20 = vpop.eup %3356  ;;  %v997_v23 = vadd.f32 1.0, %v3355_v8 }
 0x471   :  { %v1003_v24 = vadd.f32 1.0, %v3357_v20  ;;  %v3359_v31 = vpop.eup %3358 }
 0x472   :  { %3362 = vrcp.f32 %v997_v23  ;;  %v3361_v33 = vpop.eup %3360  ;;  %v1010_v30 = vadd.f32 1.0, %v3359_v31 }
 0x473   :  { %3364 = vrcp.f32 %v1003_v24 }
 0x474   :  { %3366 = vrcp.f32 %v1010_v30 }
 0x47c   :  { %v3363_v13 = vpop.eup %3362 }
 0x47d   :  { %v3365_v40 = vpop.eup %3364  ;;  %v1014_v43 = vmul.f32 %v3363_v13, %v3361_v33 }
 0x47e   :  { %v1013_v53 = vmul.f32 %v3365_v40, %v4076_v41  ;;  %v3367_v49 = vpop.eup %3366 }
 0x480   :  { %v4122_v54 = vadd.f32 %v1014_v43, %v1013_v53 }
 0x482   :  { %3368 = vtanh.f32 %v4122_v54 }
 0x48c   :  { %v3369_v56 = vpop.eup %3368 }
 0x48d   :  { %v4125_v58 = vmul.f32 %v3369_v56, %v3367_v49 }
 0x48f   :  { %1083 = vmatmul.mubr.f32.vlgmr.msra.gmra.mrb[8].mxu0 %v4125_v58  ;;  %1154 = vmatmul.mubr.f32.vlgmr.msra.gmra.mrb[8].mxu1 %v4125_v58 }
 0x490   :  { %2921 = vmatpush1.bf16.msra.mxu0 %v3817_v21  ;;  %2953 = vmatpush1.bf16.msra.mxu1 %v3822_v25 }
 0x491   :  { %2923 = vmatprep.subr.bf16.mxu0 %v3827_v29  ;;  %2955 = vmatprep.subr.bf16.mxu1 %v3834_v35 }
 0x492   :  { %1252 = vmatprep.mubr.f32.mxu0 %v3623_v0  ;;  %1323 = vmatprep.mubr.f32.mxu1 %v3623_v0 }
 0x494   :  { %2925 = vmatpush1.bf16.msra.mxu0 %v3832_v34  ;;  %2957 = vmatpush1.bf16.msra.mxu1 %v3838_v38 }
 0x495   :  { %2927 = vmatprep.subr.bf16.mxu0 %v3844_v42  ;;  %2959 = vmatprep.subr.bf16.mxu1 %v3853_v48 }
 0x498   :  { %2929 = vmatpush1.bf16.msra.mxu0 %v3851_v47  ;;  %2961 = vmatpush1.bf16.msra.mxu1 %v3857_v51 }
 0x499   :  { %2931 = vmatprep.subr.bf16.mxu0 %v3863_v55  ;;  %2963 = vmatprep.subr.bf16.mxu1 %v3872_v61 }
 0x49c   :  { %2933 = vmatpush1.bf16.msra.mxu0 %v3870_v60  ;;  %2965 = vmatpush1.bf16.msra.mxu1 %v3876_v1 }
 0x49d   :  { %2935 = vmatprep.subr.bf16.mxu0 %v3882_v5  ;;  %2967 = vmatprep.subr.bf16.mxu1 %v3891_v11 }
 0x4a0   :  { %2937 = vmatpush1.bf16.msra.mxu0 %v3889_v10  ;;  %2969 = vmatpush1.bf16.msra.mxu1 %v3895_v14 }
 0x4a1   :  { %2939 = vmatprep.subr.bf16.mxu0 %v3901_v19  ;;  %2971 = vmatprep.subr.bf16.mxu1 %v3910_v28 }
 0x4a4   :  { %2941 = vmatpush1.bf16.msra.mxu0 %v3908_v27  ;;  %2973 = vmatpush1.bf16.msra.mxu1 %v3914_v32 }
 0x4a5   :  { %2943 = vmatprep.subr.bf16.mxu0 %v3921_v39  ;;  %2975 = vmatprep.subr.bf16.mxu1 %v3929_v50 }
 0x4a8   :  { %2945 = vmatpush1.bf16.msra.mxu0 %v3925_v44  ;;  %2977 = vmatpush1.bf16.msra.mxu1 %v3931_v52 }
 0x4a9   :  { %2947 = vmatprep.subr.bf16.mxu0 %v3938_v57  ;;  %2979 = vmatprep.subr.bf16.mxu1 %v3946_v6 }
 0x4ac   :  { %2949 = vmatpush1.bf16.msra.mxu0 %v3942_v63  ;;  %2981 = vmatpush1.bf16.msra.mxu1 %v3950_v7 }
 0x4ad   :  { %2983 = vmatprep.subr.bf16.mxu0 %v3815_v17  ;;  %3015 = vmatprep.subr.bf16.mxu1 %v3819_v22 }
 0x562   :  { %v1084_v41 = vpop.f32.mrb[8].mxu0  ;;  %v1155_v59 = vpop.f32.mrb[8].mxu1 }
 0x563   :  { %v3244_v62 = vadd.f32 %v1084_v41, %v3968_v16  ;;  %v1086_v2 = vpop.f32.mrb[9].mxu0  ;;  %v1157_v3 = vpop.f32.mrb[9].mxu1  ;;  %v3258_v31 = vadd.f32 %v1155_v59, %v3981_v45 }
 0x564   :  { %v3245_v4 = vadd.f32 %v1086_v2, %v3972_v18  ;;  %v3259_v23 = vadd.f32 %v1157_v3, %v3977_v36 }
 0x565   :  { %v2427_v8 = vmul.f32 -1.442695, %v3244_v62 }
 0x566   :  { %v2428_v20 = vmul.f32 -1.442695, %v3245_v4  ;;  %v2429_v24 = vmul.f32 -1.442695, %v3259_v23 }
 0x567   :  { %3370 = vpow2.f32 %v2427_v8 }
 0x568   :  { %3372 = vpow2.f32 %v2428_v20 }
 0x569   :  { %3374 = vpow2.f32 %v2429_v24 }
 0x56a   :  { %3376 = vtanh.f32 %v3258_v31 }
 0x571   :  { %v3371_v33 = vpop.eup %3370 }
 0x572   :  { %v3373_v13 = vpop.eup %3372  ;;  %v1167_v40 = vadd.f32 1.0, %v3371_v33 }
 0x573   :  { %v1173_v43 = vadd.f32 1.0, %v3373_v13  ;;  %v3375_v30 = vpop.eup %3374 }
 0x574   :  { %3378 = vrcp.f32 %v1167_v40  ;;  %v3377_v53 = vpop.eup %3376  ;;  %v1180_v62 = vadd.f32 1.0, %v3375_v30 }
 0x575   :  { %3380 = vrcp.f32 %v1173_v43 }
 0x576   :  { %3382 = vrcp.f32 %v1180_v62 }
 0x57e   :  { %v3379_v49 = vpop.eup %3378 }
 0x57f   :  { %v3381_v56 = vpop.eup %3380  ;;  %v1184_v41 = vmul.f32 %v3379_v49, %v3377_v53 }
 0x580   :  { %v1183_v2 = vmul.f32 %v3381_v56, %v4122_v54  ;;  %v3383_v59 = vpop.eup %3382 }
 0x582   :  { %v4168_v3 = vadd.f32 %v1184_v41, %v1183_v2 }
 0x584   :  { %3384 = vtanh.f32 %v4168_v3 }
 0x58e   :  { %v3385_v4 = vpop.eup %3384 }
 0x58f   :  { %v4171_v8 = vmul.f32 %v3385_v4, %v3383_v59 }
 0x591   :  { %1253 = vmatmul.mubr.f32.vlgmr.msra.gmra.mrb[10].mxu0 %v4171_v8  ;;  %1324 = vmatmul.mubr.f32.vlgmr.msra.gmra.mrb[10].mxu1 %v4171_v8 }
 0x592   :  { %2985 = vmatpush1.bf16.msra.mxu0 %v3817_v21  ;;  %3017 = vmatpush1.bf16.msra.mxu1 %v3822_v25 }
 0x593   :  { %2987 = vmatprep.subr.bf16.mxu0 %v3827_v29  ;;  %3019 = vmatprep.subr.bf16.mxu1 %v3834_v35 }
 0x594   :  { %1422 = vmatprep.mubr.f32.mxu0 %v3623_v0  ;;  %1493 = vmatprep.mubr.f32.mxu1 %v3623_v0 }
 0x596   :  { %2989 = vmatpush1.bf16.msra.mxu0 %v3832_v34  ;;  %3021 = vmatpush1.bf16.msra.mxu1 %v3838_v38 }
 0x597   :  { %2991 = vmatprep.subr.bf16.mxu0 %v3844_v42  ;;  %3023 = vmatprep.subr.bf16.mxu1 %v3853_v48 }
 0x59a   :  { %2993 = vmatpush1.bf16.msra.mxu0 %v3851_v47  ;;  %3025 = vmatpush1.bf16.msra.mxu1 %v3857_v51 }
 0x59b   :  { %2995 = vmatprep.subr.bf16.mxu0 %v3863_v55  ;;  %3027 = vmatprep.subr.bf16.mxu1 %v3872_v61 }
 0x59e   :  { %2997 = vmatpush1.bf16.msra.mxu0 %v3870_v60  ;;  %3029 = vmatpush1.bf16.msra.mxu1 %v3876_v1 }
 0x59f   :  { %2999 = vmatprep.subr.bf16.mxu0 %v3882_v5  ;;  %3031 = vmatprep.subr.bf16.mxu1 %v3891_v11 }
 0x5a2   :  { %3001 = vmatpush1.bf16.msra.mxu0 %v3889_v10  ;;  %3033 = vmatpush1.bf16.msra.mxu1 %v3895_v14 }
 0x5a3   :  { %3003 = vmatprep.subr.bf16.mxu0 %v3901_v19  ;;  %3035 = vmatprep.subr.bf16.mxu1 %v3910_v28 }
 0x5a6   :  { %3005 = vmatpush1.bf16.msra.mxu0 %v3908_v27  ;;  %3037 = vmatpush1.bf16.msra.mxu1 %v3914_v32 }
 0x5a7   :  { %3007 = vmatprep.subr.bf16.mxu0 %v3921_v39  ;;  %3039 = vmatprep.subr.bf16.mxu1 %v3929_v50 }
 0x5aa   :  { %3009 = vmatpush1.bf16.msra.mxu0 %v3925_v44  ;;  %3041 = vmatpush1.bf16.msra.mxu1 %v3931_v52 }
 0x5ab   :  { %3011 = vmatprep.subr.bf16.mxu0 %v3938_v57  ;;  %3043 = vmatprep.subr.bf16.mxu1 %v3946_v6 }
 0x5ae   :  { %3013 = vmatpush1.bf16.msra.mxu0 %v3942_v63  ;;  %3045 = vmatpush1.bf16.msra.mxu1 %v3950_v7 }
 0x5af   :  { %3047 = vmatprep.subr.bf16.mxu0 %v3815_v17  ;;  %3079 = vmatprep.subr.bf16.mxu1 %v3819_v22 }
 0x664   :  { %v1254_v54 = vpop.f32.mrb[10].mxu0  ;;  %v1325_v20 = vpop.f32.mrb[10].mxu1 }
 0x665   :  { %v3246_v23 = vadd.f32 %v1254_v54, %v3968_v16  ;;  %v1256_v24 = vpop.f32.mrb[11].mxu0  ;;  %v1327_v31 = vpop.f32.mrb[11].mxu1  ;;  %v3260_v53 = vadd.f32 %v1325_v20, %v3981_v45 }
 0x666   :  { %v3247_v33 = vadd.f32 %v1256_v24, %v3972_v18  ;;  %v3261_v43 = vadd.f32 %v1327_v31, %v3977_v36 }
 0x667   :  { %v2430_v13 = vmul.f32 -1.442695, %v3246_v23 }
 0x668   :  { %v2431_v40 = vmul.f32 -1.442695, %v3247_v33  ;;  %v2432_v30 = vmul.f32 -1.442695, %v3261_v43  ;;  %v1703_v43 = vld [vmem:[%s4639_s4 + $0x28] sm:$0xff] }
 0x669   :  { %3386 = vpow2.f32 %v2430_v13 }
 0x66a   :  { %3388 = vpow2.f32 %v2431_v40  ;;  %v1702_v40 = vld [vmem:[%s4639_s4 + $0x20] sm:$0xff] }
 0x66b   :  { %3390 = vpow2.f32 %v2432_v30  ;;  %v3118_v30 = vpack.c.bf16 %v1703_v43, %v1702_v40  ;;  %v1861_v40 = vld [vmem:[%s4641_s6 + $0xd8] sm:$0xff] }
 0x66c   :  { %3392 = vtanh.f32 %v3260_v53  ;;  %v1704_v53 = vld [vmem:[%s4639_s4 + $0x30] sm:$0xff] }
 0x673   :  { %v3387_v17 = vpop.eup %3386 }
 0x674   :  { %v3389_v49 = vpop.eup %3388  ;;  %v1337_v22 = vadd.f32 1.0, %v3387_v17  ;;  %v1705_v17 = vld [vmem:[%s4639_s4 + $0x38] sm:$0xff] }
 0x675   :  { %v1343_v56 = vadd.f32 1.0, %v3389_v49  ;;  %v3391_v41 = vpop.eup %3390  ;;  %v3122_v49 = vpack.c.bf16 %v1705_v17, %v1704_v53  ;;  %v1860_v53 = vld [vmem:[%s4641_s6 + $0xd0] sm:$0xff] }
 0x676   :  { %3394 = vrcp.f32 %v1337_v22  ;;  %v3393_v62 = vpop.eup %3392  ;;  %v1350_v54 = vadd.f32 1.0, %v3391_v41  ;;  %v1706_v22 = vld [vmem:[%s4639_s4 + $0x40] sm:$0xff]  ;;  %v1708_v41 = vld [vmem:[%s4639_s4 + $0x50] sm:$0xff] }
 0x677   :  { %3396 = vrcp.f32 %v1343_v56 }
 0x678   :  { %3398 = vrcp.f32 %v1350_v54 }
 0x680   :  { %v3395_v2 = vpop.eup %3394 }
 0x681   :  { %v3397_v59 = vpop.eup %3396  ;;  %v1354_v4 = vmul.f32 %v3395_v2, %v3393_v62  ;;  %v1709_v62 = vld [vmem:[%s4639_s4 + $0x58] sm:$0xff] }
 0x682   :  { %v1353_v23 = vmul.f32 %v3397_v59, %v4168_v3  ;;  %v3399_v20 = vpop.eup %3398  ;;  %v3130_v2 = vpack.c.bf16 %v1709_v62, %v1708_v41  ;;  %v1710_v59 = vld [vmem:[%s4639_s4 + $0x60] sm:$0xff]  ;;  %v1864_v41 = vld [vmem:[%s4641_s6 + $0xf0] sm:$0xff] }
 0x684   :  { %v4214_v24 = vadd.f32 %v1354_v4, %v1353_v23  ;;  %v1711_v4 = vld [vmem:[%s4639_s4 + $0x68] sm:$0xff]  ;;  %v1712_v23 = vld [vmem:[%s4639_s4 + $0x70] sm:$0xff] }
 0x685   :  { %v3134_v54 = vpack.c.bf16 %v1711_v4, %v1710_v59  ;;  %v2104_v59 = vld [vmem:[#allocation9 + $0x8] sm:$0xff]  ;;  %v2105_v4 = vld [vmem:[#allocation9 + $0x10] sm:$0xff] }
 0x686   :  { %3400 = vtanh.f32 %v4214_v24 }
 0x690   :  { %v3401_v31 = vpop.eup %3400 }
 0x691   :  { %v4217_v33 = vmul.f32 %v3401_v31, %v3399_v20  ;;  %v1835_v31 = vld [vmem:[%s4641_s6 + $0x8] sm:$0xff] }
 0x693   :  { %1423 = vmatmul.mubr.f32.vlgmr.msra.gmra.mrb[12].mxu0 %v4217_v33  ;;  %1494 = vmatmul.mubr.f32.vlgmr.msra.gmra.mrb[12].mxu1 %v4217_v33 }
 0x694   :  { %3049 = vmatpush1.bf16.msra.mxu0 %v3817_v21  ;;  %3081 = vmatpush1.bf16.msra.mxu1 %v3822_v25  ;;  %v1698_v21 = vld [vmem:[%s4639_s4] sm:$0xff]  ;;  %v1699_v25 = vld [vmem:[%s4639_s4 + $0x8] sm:$0xff] }
 0x695   :  { %3051 = vmatprep.subr.bf16.mxu0 %v3827_v29  ;;  %3083 = vmatprep.subr.bf16.mxu1 %v3834_v35  ;;  %v3110_v29 = vpack.c.bf16 %v1699_v25, %v1698_v21  ;;  %v1837_v21 = vld [vmem:[%s4641_s6 + $0x18] sm:$0xff] }
 0x696   :  { %1592 = vmatprep.mubr.f32.mxu0 %v3623_v0  ;;  %1663 = vmatprep.mubr.f32.mxu1 %v3623_v0  ;;  %v3142_v25 = vpack.c.bf16 %v1837_v21, %v1835_v31 }
 0x698   :  { %3053 = vmatpush1.bf16.msra.mxu0 %v3832_v34  ;;  %3085 = vmatpush1.bf16.msra.mxu1 %v3838_v38 }
 0x699   :  { %3055 = vmatprep.subr.bf16.mxu0 %v3844_v42  ;;  %3087 = vmatprep.subr.bf16.mxu1 %v3853_v48 }
 0x69c   :  { %3057 = vmatpush1.bf16.msra.mxu0 %v3851_v47  ;;  %3089 = vmatpush1.bf16.msra.mxu1 %v3857_v51 }
 0x69d   :  { %3059 = vmatprep.subr.bf16.mxu0 %v3863_v55  ;;  %3091 = vmatprep.subr.bf16.mxu1 %v3872_v61 }
 0x6a0   :  { %3061 = vmatpush1.bf16.msra.mxu0 %v3870_v60  ;;  %3093 = vmatpush1.bf16.msra.mxu1 %v3876_v1 }
 0x6a1   :  { %3063 = vmatprep.subr.bf16.mxu0 %v3882_v5  ;;  %3095 = vmatprep.subr.bf16.mxu1 %v3891_v11 }
 0x6a4   :  { %3065 = vmatpush1.bf16.msra.mxu0 %v3889_v10  ;;  %3097 = vmatpush1.bf16.msra.mxu1 %v3895_v14 }
 0x6a5   :  { %3067 = vmatprep.subr.bf16.mxu0 %v3901_v19  ;;  %3099 = vmatprep.subr.bf16.mxu1 %v3910_v28 }
 0x6a8   :  { %3069 = vmatpush1.bf16.msra.mxu0 %v3908_v27  ;;  %3101 = vmatpush1.bf16.msra.mxu1 %v3914_v32 }
 0x6a9   :  { %3071 = vmatprep.subr.bf16.mxu0 %v3921_v39  ;;  %3103 = vmatprep.subr.bf16.mxu1 %v3929_v50 }
 0x6ac   :  { %3073 = vmatpush1.bf16.msra.mxu0 %v3925_v44  ;;  %3105 = vmatpush1.bf16.msra.mxu1 %v3931_v52 }
 0x6ad   :  { %3075 = vmatprep.subr.bf16.mxu0 %v3938_v57  ;;  %3107 = vmatprep.subr.bf16.mxu1 %v3946_v6  ;;  %v1700_v57 = vld [vmem:[%s4639_s4 + $0x10] sm:$0xff] }
 0x6b0   :  { %3077 = vmatpush1.bf16.msra.mxu0 %v3942_v63  ;;  %3109 = vmatpush1.bf16.msra.mxu1 %v3950_v7  ;;  %v1701_v63 = vld [vmem:[%s4639_s4 + $0x18] sm:$0xff] }
 0x6b1   :  { %3111 = vmatprep.subr.bf16.mxu0 %v3110_v29  ;;  %v3114_v13 = vpack.c.bf16 %v1701_v63, %v1700_v57  ;;  %3143 = vmatprep.subr.bf16.mxu1 %v3142_v25  ;;  %v1857_v57 = vld [vmem:[%s4641_s6 + $0xb8] sm:$0xff] }
 0x766   :  { %v1424_v34 = vpop.f32.mrb[12].mxu0  ;;  %v1495_v35 = vpop.f32.mrb[12].mxu1 }
 0x767   :  { %v3248_v38 = vadd.f32 %v1424_v34, %v3968_v16  ;;  %v1426_v42 = vpop.f32.mrb[13].mxu0  ;;  %v1497_v47 = vpop.f32.mrb[13].mxu1  ;;  %v3262_v1 = vadd.f32 %v1495_v35, %v3981_v45  ;;  %v1838_v34 = vld [vmem:[%s4641_s6 + $0x20] sm:$0xff]  ;;  %v1840_v35 = vld [vmem:[%s4641_s6 + $0x30] sm:$0xff] }
 0x768   :  { %v3249_v48 = vadd.f32 %v1426_v42, %v3972_v18  ;;  %v3263_v60 = vadd.f32 %v1497_v47, %v3977_v36  ;;  %v1843_v42 = vld [vmem:[%s4641_s6 + $0x48] sm:$0xff]  ;;  %v1845_v47 = vld [vmem:[%s4641_s6 + $0x58] sm:$0xff] }
 0x769   :  { %v2433_v51 = vmul.f32 -1.442695, %v3248_v38  ;;  %v3148_v38 = vpack.c.bf16 %v1840_v35, %v1838_v34 }
 0x76a   :  { %v2434_v55 = vmul.f32 -1.442695, %v3249_v48  ;;  %v2435_v61 = vmul.f32 -1.442695, %v3263_v60  ;;  %v3150_v48 = vpack.c.bf16 %v1845_v47, %v1843_v42 }
 0x76b   :  { %3402 = vpow2.f32 %v2433_v51  ;;  %v1842_v51 = vld [vmem:[%s4641_s6 + $0x40] sm:$0xff] }
 0x76c   :  { %3404 = vpow2.f32 %v2434_v55  ;;  %v1844_v55 = vld [vmem:[%s4641_s6 + $0x50] sm:$0xff] }
 0x76d   :  { %3406 = vpow2.f32 %v2435_v61  ;;  %v3152_v60 = vpack.c.bf16 %v1844_v55, %v1842_v51  ;;  %v1847_v61 = vld [vmem:[%s4641_s6 + $0x68] sm:$0xff] }
 0x76e   :  { %3408 = vtanh.f32 %v3262_v1  ;;  %v1849_v1 = vld [vmem:[%s4641_s6 + $0x78] sm:$0xff] }
 0x775   :  { %v3403_v5 = vpop.eup %3402 }
 0x776   :  { %v3405_v10 = vpop.eup %3404  ;;  %v1507_v11 = vadd.f32 1.0, %v3403_v5  ;;  %v3154_v5 = vpack.c.bf16 %v1849_v1, %v1847_v61 }
 0x777   :  { %v1513_v14 = vadd.f32 1.0, %v3405_v10  ;;  %v3407_v19 = vpop.eup %3406  ;;  %v1846_v10 = vld [vmem:[%s4641_s6 + $0x60] sm:$0xff] }
 0x778   :  { %3410 = vrcp.f32 %v1507_v11  ;;  %v3409_v27 = vpop.eup %3408  ;;  %v1520_v44 = vadd.f32 1.0, %v3407_v19  ;;  %v1848_v11 = vld [vmem:[%s4641_s6 + $0x70] sm:$0xff]  ;;  %v1851_v19 = vld [vmem:[%s4641_s6 + $0x88] sm:$0xff] }
 0x779   :  { %3412 = vrcp.f32 %v1513_v14  ;;  %v3156_v14 = vpack.c.bf16 %v1848_v11, %v1846_v10 }
 0x77a   :  { %3414 = vrcp.f32 %v1520_v44 }
 0x782   :  { %v3411_v28 = vpop.eup %3410 }
 0x783   :  { %v3413_v32 = vpop.eup %3412  ;;  %v1524_v39 = vmul.f32 %v3411_v28, %v3409_v27  ;;  %v1853_v27 = vld [vmem:[%s4641_s6 + $0x98] sm:$0xff] }
 0x784   :  { %v1523_v50 = vmul.f32 %v3413_v32, %v4214_v24  ;;  %v3415_v6 = vpop.eup %3414  ;;  %v1713_v24 = vld [vmem:[%s4639_s4 + $0x78] sm:$0xff]  ;;  %v3158_v28 = vpack.c.bf16 %v1853_v27, %v1851_v19  ;;  %v1850_v32 = vld [vmem:[%s4641_s6 + $0x80] sm:$0xff] }
 0x785   :  { %v3138_v20 = vpack.c.bf16 %v1713_v24, %v1712_v23  ;;  %v2106_v23 = vld [vmem:[#allocation9 + $0x18] sm:$0xff] }
 0x786   :  { %v4264_v52 = vadd.f32 %v1524_v39, %v1523_v50  ;;  %v1852_v39 = vld [vmem:[%s4641_s6 + $0x90] sm:$0xff]  ;;  %v1855_v50 = vld [vmem:[%s4641_s6 + $0xa8] sm:$0xff]  ;;  %v3178_v24 = vpack.c.bf16 %v2106_v23, %v2105_v4 }
 0x787   :  { %v3160_v44 = vpack.c.bf16 %v1852_v39, %v1850_v32  ;;  %v3162_v63 = vpack.c.bf16 %v1857_v57, %v1855_v50  ;;  %v2116_v23 = vld [vmem:[#allocation9 + $0x68] sm:$0xff] }
 0x788   :  { %3416 = vtanh.f32 %v4264_v52 }
 0x792   :  { %v3417_v7 = vpop.eup %3416 }
 0x793   :  { %v1527_v3 = vmul.f32 %v3417_v7, %v3415_v6  ;;  %v1854_v6 = vld [vmem:[%s4641_s6 + $0xa0] sm:$0xff]  ;;  %v1856_v7 = vld [vmem:[%s4641_s6 + $0xb0] sm:$0xff] }
 0x795   :  { %1593 = vmatmul.mubr.f32.vlgmr.msra.gmra.mrb[14].mxu0 %v1527_v3  ;;  %1664 = vmatmul.mubr.f32.vlgmr.msra.gmra.mrb[14].mxu1 %v1527_v3 }
 0x796   :  { %3113 = vmatpush3.bf16.msra.mxu0 %v3110_v29  ;;  %2554 = vmatprep.mubr.f32.mxu0 %v3987_v26  ;;  %v1707_v26 = vld [vmem:[%s4639_s4 + $0x48] sm:$0xff] }
 0x797   :  { %3115 = vmatprep.subr.bf16.mxu0 %v3114_v13  ;;  %1942 = vmatprep.mubr.f32.mxu1 %v3623_v0  ;;  %v3126_v56 = vpack.c.bf16 %v1707_v26, %v1706_v22  ;;  %v1865_v22 = vld [vmem:[%s4641_s6 + $0xf8] sm:$0xff] }
 0x79a   :  { %3117 = vmatpush3.bf16.msra.mxu0 %v3114_v13  ;;  %v1859_v13 = vld [vmem:[%s4641_s6 + $0xc8] sm:$0xff] }
 0x79b   :  { %3119 = vmatprep.subr.bf16.mxu0 %v3118_v30  ;;  %v3166_v43 = vpack.c.bf16 %v1861_v40, %v1859_v13 }
 0x79e   :  { %3121 = vmatpush3.bf16.msra.mxu0 %v3118_v30  ;;  %v1858_v30 = vld [vmem:[%s4641_s6 + $0xc0] sm:$0xff] }
 0x79f   :  { %3123 = vmatprep.subr.bf16.mxu0 %v3122_v49  ;;  %v3168_v17 = vpack.c.bf16 %v1860_v53, %v1858_v30  ;;  %v2107_v30 = vld [vmem:[#allocation9 + $0x20] sm:$0xff]  ;;  %v2108_v53 = vld [vmem:[#allocation9 + $0x28] sm:$0xff] }
 0x7a2   :  { %3125 = vmatpush3.bf16.msra.mxu0 %v3122_v49  ;;  %v1863_v49 = vld [vmem:[%s4641_s6 + $0xe8] sm:$0xff] }
 0x7a3   :  { %3127 = vmatprep.subr.bf16.mxu0 %v3126_v56  ;;  %v3170_v26 = vpack.c.bf16 %v1865_v22, %v1863_v49  ;;  %v2109_v49 = vld [vmem:[#allocation9 + $0x30] sm:$0xff]  ;;  %v2110_v22 = vld [vmem:[#allocation9 + $0x38] sm:$0xff] }
 0x7a6   :  { %3129 = vmatpush3.bf16.msra.mxu0 %v3126_v56  ;;  %v1862_v56 = vld [vmem:[%s4641_s6 + $0xe0] sm:$0xff] }
 0x7a7   :  { %3131 = vmatprep.subr.bf16.mxu0 %v3130_v2  ;;  %v3172_v62 = vpack.c.bf16 %v1864_v41, %v1862_v56  ;;  %v2111_v56 = vld [vmem:[#allocation9 + $0x40] sm:$0xff]  ;;  %v2112_v41 = vld [vmem:[#allocation9 + $0x48] sm:$0xff] }
 0x7aa   :  { %3133 = vmatpush3.bf16.msra.mxu0 %v3130_v2  ;;  %v2103_v2 = vld [vmem:[#allocation9] sm:$0xff] }
 0x7ab   :  { %3135 = vmatprep.subr.bf16.mxu0 %v3134_v54 }
 0x7ae   :  { %3137 = vmatpush3.bf16.msra.mxu0 %v3134_v54  ;;  %v3174_v54 = vpack.c.bf16 %v2104_v59, %v2103_v2  ;;  %v2113_v2 = vld [vmem:[#allocation9 + $0x50] sm:$0xff]  ;;  %v2114_v59 = vld [vmem:[#allocation9 + $0x58] sm:$0xff] }
 0x7af   :  { %3139 = vmatprep.subr.bf16.mxu0 %v3138_v20  ;;  %v3194_v4 = vpack.c.bf16 %v2114_v59, %v2113_v2 }
 0x7b2   :  { %3141 = vmatpush3.bf16.msra.mxu0 %v3138_v20 }
 0x7b3   :  { %3175 = vmatprep.subr.bf16.mxu0 %v3174_v54 }
 0x7b5   :  { %2555 = vmatmul.mubr.f32.vlgmr.msra.gmra.mrb[16].mxu0 %v4033_v37  ;;  %v1834_v37 = vld [vmem:[%s4641_s6] sm:$0xff] }
 0x7b6   :  { %2557 = vmatprep.mubr.f32.mxu0 %v4079_v46  ;;  %v1836_v46 = vld [vmem:[%s4641_s6 + $0x10] sm:$0xff]  ;;  %3177 = vmatpush3.bf16.msra.mxu0 %v3174_v54  ;;  %v2115_v54 = vld [vmem:[#allocation9 + $0x60] sm:$0xff] }
 0x7b7   :  { %3179 = vmatprep.subr.bf16.mxu0 %v3178_v24 }
 0x7b9   :  { %2558 = vmatmul.mubr.f32.gmra.mrb[18].mxu0 %v4125_v58  ;;  %v3144_v58 = vpack.c.bf16 %v1836_v46, %v1834_v37 }
 0x7ba   :  { %2560 = vmatprep.mubr.f32.mxu0 %v4171_v8  ;;  %v1839_v8 = vld [vmem:[%s4641_s6 + $0x28] sm:$0xff]  ;;  %3181 = vmatpush3.bf16.msra.mxu0 %v3178_v24  ;;  %v3198_v24 = vpack.c.bf16 %v2116_v23, %v2115_v54 }
 0x7bb   :  { %3145 = vmatpush1.bf16.msra.mxu1 %v3144_v58 }
 0x7bd   :  { %2561 = vmatmul.mubr.f32.gmra.mrb[20].mxu0 %v4217_v33  ;;  %v1841_v33 = vld [vmem:[%s4641_s6 + $0x38] sm:$0xff] }
 0x7be   :  { %2563 = vmatprep.mubr.f32.mxu0 %v1527_v3  ;;  %v3146_v29 = vpack.c.bf16 %v1841_v33, %v1839_v8  ;;  %v3164_v3 = vpack.c.bf16 %v1856_v7, %v1854_v6 }
 0x7c0   :  { %3147 = vmatprep.subr.bf16.mxu1 %v3146_v29 }
 0x7c1   :  { %3149 = vmatpush1.bf16.msra.mxu1 %v3148_v38 }
 0x7c2   :  { %3151 = vmatprep.subr.bf16.mxu1 %v3150_v48 }
 0x7c5   :  { %3153 = vmatpush1.bf16.msra.mxu1 %v3152_v60 }
 0x7c6   :  { %3155 = vmatprep.subr.bf16.mxu1 %v3154_v5 }
 0x7c9   :  { %3157 = vmatpush1.bf16.msra.mxu1 %v3156_v14 }
 0x7ca   :  { %3159 = vmatprep.subr.bf16.mxu1 %v3158_v28 }
 0x7cd   :  { %3161 = vmatpush1.bf16.msra.mxu1 %v3160_v44 }
 0x7ce   :  { %3163 = vmatprep.subr.bf16.mxu1 %v3162_v63 }
 0x7d1   :  { %3165 = vmatpush1.bf16.msra.mxu1 %v3164_v3 }
 0x7d2   :  { %3167 = vmatprep.subr.bf16.mxu1 %v3166_v43 }
 0x7d5   :  { %3169 = vmatpush1.bf16.msra.mxu1 %v3168_v17  ;;  %v3182_v17 = vpack.c.bf16 %v2108_v53, %v2107_v30 }
 0x7d6   :  { %3171 = vmatprep.subr.bf16.mxu1 %v3170_v26  ;;  %v3186_v26 = vpack.c.bf16 %v2110_v22, %v2109_v49 }
 0x7d7   :  { %3183 = vmatprep.subr.bf16.mxu0 %v3182_v17 }
 0x7d8   :  { %3185 = vmatpush3.bf16.msra.mxu0 %v3182_v17 }
 0x7d9   :  { %3173 = vmatpush1.bf16.msra.mxu1 %v3172_v62  ;;  %3187 = vmatprep.subr.bf16.mxu0 %v3186_v26  ;;  %v3190_v62 = vpack.c.bf16 %v2112_v41, %v2111_v56 }
 0x7dc   :  { %3189 = vmatpush3.bf16.msra.mxu0 %v3186_v26 }
 0x7dd   :  { %3191 = vmatprep.subr.bf16.mxu0 %v3190_v62 }
 0x7e0   :  { %3193 = vmatpush3.bf16.msra.mxu0 %v3190_v62  ;;  %v2017_v62 = vld [vmem:[%s4647_s12 + $0x10] sm:$0xff] }
 0x7e1   :  { %3195 = vmatprep.subr.bf16.mxu0 %v3194_v4 }
 0x7e4   :  { %3197 = vmatpush3.bf16.msra.mxu0 %v3194_v4 }
 0x7e5   :  { %3199 = vmatprep.subr.bf16.mxu0 %v3198_v24 }
 0x7e8   :  { %3201 = vmatpush3.bf16.msra.mxu0 %v3198_v24 }
 0x868   :  { %v1594_v20 = vpop.f32.mrb[14].mxu0  ;;  %v1665_v31 = vpop.f32.mrb[14].mxu1 }
 0x869   :  { %v3250_v21 = vadd.f32 %v1594_v20, %v3968_v16  ;;  %v1596_v25 = vpop.f32.mrb[15].mxu0  ;;  %v1667_v37 = vpop.f32.mrb[15].mxu1  ;;  %v3264_v34 = vadd.f32 %v1665_v31, %v3981_v45  ;;  %v2117_v20 = vld [vmem:[#allocation9 + $0x70] sm:$0xff]  ;;  %v2118_v31 = vld [vmem:[#allocation9 + $0x78] sm:$0xff] }
 0x86a   :  { %v3251_v46 = vadd.f32 %v1596_v25, %v3972_v18  ;;  %v3265_v33 = vadd.f32 %v1667_v37, %v3977_v36  ;;  %v4417_v36 = vld [vmem:[#allocation7] ss:$0 sm:$0xff]  ;;  %v1866_v25 = vld [vmem:[%s4642_s7] sm:$0x3] }
 0x86b   :  { %v2436_v58 = vmul.f32 -1.442695, %v3250_v21  ;;  %v3202_v21 = vpack.c.bf16 %v2118_v31, %v2117_v20  ;;  %v4436_v37 = vrot.slane %v1866_v25, %v155_v15 }
 0x86c   :  { %v2437_v8 = vmul.f32 -1.442695, %v3251_v46  ;;  %v2438_v29 = vmul.f32 -1.442695, %v3265_v33 }
 0x86d   :  { %3418 = vpow2.f32 %v2436_v58  ;;  %3203 = vmatprep.subr.bf16.mxu0 %v3202_v21 }
 0x86e   :  { %3420 = vpow2.f32 %v2437_v8  ;;  %3205 = vmatpush3.bf16.msra.mxu0 %v3202_v21 }
 0x86f   :  { %3422 = vpow2.f32 %v2438_v29 }
 0x870   :  { %3424 = vtanh.f32 %v3264_v34 }
 0x877   :  { %v3419_v35 = vpop.eup %3418 }
 0x878   :  { %v3421_v38 = vpop.eup %3420  ;;  %v1677_v42 = vadd.f32 1.0, %v3419_v35 }
 0x879   :  { %v1683_v47 = vadd.f32 1.0, %v3421_v38  ;;  %v3423_v16 = vpop.eup %3422 }
 0x87a   :  { %3426 = vrcp.f32 %v1677_v42  ;;  %v3425_v48 = vpop.eup %3424  ;;  %v1690_v60 = vadd.f32 1.0, %v3423_v16 }
 0x87b   :  { %3428 = vrcp.f32 %v1683_v47 }
 0x87c   :  { %3430 = vrcp.f32 %v1690_v60 }
 0x884   :  { %v3427_v18 = vpop.eup %3426 }
 0x885   :  { %v3429_v51 = vpop.eup %3428  ;;  %v1694_v55 = vmul.f32 %v3427_v18, %v3425_v48 }
 0x886   :  { %v1693_v61 = vmul.f32 %v3429_v51, %v4264_v52  ;;  %v3431_v44 = vpop.eup %3430 }
 0x888   :  { %v2556_v1 = vpop.f32.mrb[16].mxu0  ;;  %v1695_v45 = vadd.f32 %v1694_v55, %v1693_v61  ;;  %v4448_v55 = vrot.slane %v1866_v25, %v151_v12 }
 0x889   :  { %v1787_v5 = vpop.f32.mrb[17].mxu0  ;;  %v1793_v11 = vadd.f32 %v2556_v1, %v4417_v36 }
 0x88a   :  { %v1788_v10 = vadd.f32 %v4417_v36, %v1787_v5  ;;  %3432 = vtanh.f32 %v1695_v45 }
 0x88b   :  { %v1827_v28 = vmax.f32 %v1793_v11, 0.0 }
 0x88c   :  { %v1826_v14 = vmax.f32 %v1788_v10, 0.0  ;;  %v2559_v19 = vpop.f32.mrb[18].mxu0 }
 0x88d   :  { %v1797_v27 = vpop.f32.mrb[19].mxu0  ;;  %v1803_v57 = vadd.f32 %v2559_v19, %v4417_v36 }
 0x88e   :  { %1943 = vmatmul.mubr.f32.vlgmr.msra.gmra.mrb[16].mxu1 %v1826_v14  ;;  %v1798_v52 = vadd.f32 %v4417_v36, %v1797_v27  ;;  %v2015_v27 = vld [vmem:[%s4647_s12] sm:$0xff] }
 0x88f   :  { %1948 = vmatprep.mubr.f32.mxu1 %v3623_v0  ;;  %v1829_v7 = vmax.f32 %v1803_v57, 0.0 }
 0x890   :  { %v2562_v32 = vpop.f32.mrb[20].mxu0  ;;  %v1828_v63 = vmax.f32 %v1798_v52, 0.0 }
 0x891   :  { %v1807_v39 = vpop.f32.mrb[21].mxu0  ;;  %v1813_v13 = vadd.f32 %v2562_v32, %v4417_v36 }
 0x892   :  { %1949 = vmatmul.mubr.f32.gmra.mrb[18].mxu1 %v1827_v28  ;;  %v1808_v3 = vadd.f32 %v4417_v36, %v1807_v39 }
 0x893   :  { %1954 = vmatprep.mubr.f32.mxu1 %v3623_v0  ;;  %v1831_v43 = vmax.f32 %v1813_v13, 0.0 }
 0x894   :  { %v3433_v50 = vpop.eup %3432  ;;  %v1830_v40 = vmax.f32 %v1808_v3, 0.0 }
 0x895   :  { %v1697_v6 = vmul.f32 %v3433_v50, %v3431_v44 }
 0x896   :  { %1955 = vmatmul.mubr.f32.gmra.mrb[20].mxu1 %v1828_v63 }
 0x897   :  { %2564 = vmatmul.mubr.f32.gmra.mrb[22].mxu0 %v1697_v6  ;;  %1960 = vmatprep.mubr.f32.mxu1 %v3623_v0 }
 0x89a   :  { %1961 = vmatmul.mubr.f32.gmra.mrb[22].mxu1 %v1829_v7  ;;  %v2016_v7 = vld [vmem:[%s4647_s12 + $0x8] sm:$0xff] }
 0x89b   :  { %1966 = vmatprep.mubr.f32.mxu1 %v3623_v0 }
 0x89e   :  { %1967 = vmatmul.mubr.f32.gmra.mrb[24].mxu1 %v1830_v40 }
 0x89f   :  { %1972 = vmatprep.mubr.f32.mxu1 %v3623_v0 }
 0x8a2   :  { %1973 = vmatmul.mubr.f32.gmra.mrb[26].mxu1 %v1831_v43 }
 0x8a3   :  { %1978 = vmatprep.mubr.f32.mxu1 %v3623_v0 }
 0x961   :  { %v1944_v46 = vpop.f32.mrb[16].mxu1 }
 0x962   :  { %v1946_v58 = vpop.f32.mrb[17].mxu1  ;;  %v1945_v19 = vadd.f32 %v1944_v46, %v4448_v55  ;;  %v2018_v46 = vld [vmem:[%s4647_s12 + $0x18] sm:$0xff] }
 0x963   :  { %v1947_v8 = vadd.f32 %v1946_v58, %v4436_v37 }
 0x964   :  { %v2047_v44 = vmul.f32 %v1945_v19, %v1945_v19 }
 0x965   :  { %v1991_v33 = vmul.f32 0.5, %v1947_v8  ;;  %v1950_v29 = vpop.f32.mrb[18].mxu1 }
 0x966   :  { %v1952_v34 = vpop.f32.mrb[19].mxu1  ;;  %v1951_v50 = vadd.f32 %v1950_v29, %v4448_v55 }
 0x967   :  { %v1999_v35 = vmul.f32 1.442695, %v1991_v33  ;;  %v4440_v38 = vadd.f32 %v1952_v34, %v4436_v37 }
 0x968   :  { %v2048_v49 = vmul.f32 %v1951_v50, %v1951_v50 }
 0x969   :  { %3434 = vpow2.f32 %v1999_v35  ;;  %v1992_v42 = vmul.f32 0.5, %v4440_v38  ;;  %v1956_v47 = vpop.f32.mrb[20].mxu1 }
 0x96a   :  { %v1958_v16 = vpop.f32.mrb[21].mxu1  ;;  %v2565_v48 = vpop.f32.mrb[22].mxu0  ;;  %v1957_v30 = vadd.f32 %v1956_v47, %v4448_v55 }
 0x96b   :  { %v2001_v18 = vmul.f32 1.442695, %v1992_v42  ;;  %v4444_v15 = vadd.f32 %v1958_v16, %v4436_v37  ;;  %v1817_v51 = vpop.f32.mrb[23].mxu0  ;;  %v1823_v45 = vadd.f32 %v2565_v48, %v4417_v36  ;;  %v2019_v16 = vld [vmem:[%s4647_s12 + $0x20] sm:$0xff] }
 0x96c   :  { %v1818_v60 = vadd.f32 %v4417_v36, %v1817_v51  ;;  %v2049_v23 = vmul.f32 %v1957_v30, %v1957_v30 }
 0x96d   :  { %3436 = vpow2.f32 %v2001_v18  ;;  %v1993_v61 = vmul.f32 0.5, %v4444_v15  ;;  %v1962_v1 = vpop.f32.mrb[22].mxu1  ;;  %v1833_v36 = vmax.f32 %v1823_v45, 0.0 }
 0x96e   :  { %v1832_v5 = vmax.f32 %v1818_v60, 0.0  ;;  %v1964_v10 = vpop.f32.mrb[23].mxu1  ;;  %v1963_v24 = vadd.f32 %v1962_v1, %v4448_v55 }
 0x96f   :  { %v2003_v11 = vmul.f32 1.442695, %v1993_v61  ;;  %v4454_v14 = vadd.f32 %v1964_v10, %v4436_v37  ;;  %v2020_v10 = vld [vmem:[%s4647_s12 + $0x28] sm:$0xff] }
 0x970   :  { %1979 = vmatmul.mubr.f32.gmra.mrb[28].mxu1 %v1832_v5  ;;  %v2050_v34 = vmul.f32 %v1963_v24, %v1963_v24 }
 0x971   :  { %3438 = vpow2.f32 %v2003_v11  ;;  %v1994_v9 = vmul.f32 0.5, %v4454_v14  ;;  %v1968_v12 = vpop.f32.mrb[24].mxu1  ;;  %1984 = vmatprep.mubr.f32.mxu1 %v3623_v0 }
 0x972   :  { %v1970_v28 = vpop.f32.mrb[25].mxu1  ;;  %v1969_v35 = vadd.f32 %v1968_v12, %v4448_v55 }
 0x973   :  { %v3435_v52 = vpop.eup %3434  ;;  %v2005_v32 = vmul.f32 1.442695, %v1994_v9  ;;  %v4463_v39 = vadd.f32 %v1970_v28, %v4436_v37 }
 0x974   :  { %1985 = vmatmul.mubr.f32.gmra.mrb[30].mxu1 %v1833_v36  ;;  %v2023_v57 = vmul.f32 %v3435_v52, %v2015_v27  ;;  %v2039_v63 = vmul.f32 %v3435_v52, %v3435_v52  ;;  %v2051_v61 = vmul.f32 %v1969_v35, %v1969_v35 }
 0x975   :  { %3440 = vpow2.f32 %v2005_v32  ;;  %v1995_v0 = vmul.f32 0.5, %v4463_v39  ;;  %v1974_v6 = vpop.f32.mrb[26].mxu1 }
 0x976   :  { %v1976_v3 = vpop.f32.mrb[27].mxu1  ;;  %v2031_v13 = vadd.f32 %v2023_v57, %v1945_v19  ;;  %v2055_v40 = vadd.f32 %v2047_v44, %v2039_v63  ;;  %v1975_v1 = vadd.f32 %v1974_v6, %v4448_v55  ;;  %v2239_v63 = vld [vmem:[%s4645_s10] sm:$0xff] }
 0x977   :  { %v3437_v43 = vpop.eup %3436  ;;  %v2007_v53 = vmul.f32 1.442695, %v1995_v0  ;;  %v4472_v17 = vadd.f32 %v1976_v3, %v4436_v37  ;;  %v2241_v0 = vld [vmem:[%s4645_s10 + $0x10] sm:$0xff] }
 0x978   :  { %2598 = vmatprep.mubr.f32.mxu0 %v2031_v13  ;;  %2367 = vst [vmem:[%s4648_s13] sm:$0xff] %v2031_v13  ;;  %v2063_v22 = vsub.f32 %v2055_v40, %v1947_v8  ;;  %v2024_v26 = vmul.f32 %v3437_v43, %v2016_v7  ;;  %v2040_v56 = vmul.f32 %v3437_v43, %v3437_v43  ;;  %v2242_v7 = vld [vmem:[%s4645_s10 + $0x18] sm:$0xff]  ;;  %v2243_v13 = vld [vmem:[%s4645_s10 + $0x20] sm:$0xff]  ;;  %v2244_v40 = vld [vmem:[%s4645_s10 + $0x28] sm:$0xff] }
 0x979   :  { %3442 = vpow2.f32 %v2007_v53  ;;  %v1996_v41 = vmul.f32 0.5, %v4472_v17  ;;  %v2052_v27 = vmul.f32 %v1975_v1, %v1975_v1  ;;  %v3210_v3 = vpack.c.bf16 %v2242_v7, %v2241_v0  ;;  %v2246_v53 = vld [vmem:[%s4645_s10 + $0x38] sm:$0xff] }
 0x97a   :  { %v2440_v2 = vadd.f32 -1.0, %v2063_v22  ;;  %v2032_v59 = vadd.f32 %v2024_v26, %v1951_v50  ;;  %v2056_v4 = vadd.f32 %v2048_v49, %v2040_v56  ;;  %v3214_v43 = vpack.c.bf16 %v2244_v40, %v2243_v13  ;;  %v2247_v49 = vld [vmem:[%s4645_s10 + $0x40] sm:$0xff]  ;;  %v2248_v22 = vld [vmem:[%s4645_s10 + $0x48] sm:$0xff]  ;;  %v2249_v56 = vld [vmem:[%s4645_s10 + $0x50] sm:$0xff] }
 0x97b   :  { %v3439_v54 = vpop.eup %3438  ;;  %v2009_v20 = vmul.f32 1.442695, %v1996_v41  ;;  %v3222_v26 = vpack.c.bf16 %v2248_v22, %v2247_v49  ;;  %v2250_v41 = vld [vmem:[%s4645_s10 + $0x58] sm:$0xff] }
 0x97c   :  { %2079 = vadd.xlane.f32.xlu0 %v2440_v2  ;;  %2599 = vmatmul.mubr.f32.vlgmr.msra.gmra.mrb[24].mxu0 %v2032_v59  ;;  %2368 = vst [vmem:[%s4648_s13 + $0x18] sm:$0xff] %v2032_v59  ;;  %v2064_v31 = vsub.f32 %v2056_v4, %v4440_v38  ;;  %v2025_v21 = vmul.f32 %v3439_v54, %v2017_v62  ;;  %v2251_v2 = vld [vmem:[%s4645_s10 + $0x60] sm:$0xff]  ;;  %v2252_v59 = vld [vmem:[%s4645_s10 + $0x68] sm:$0xff] }
 0x97d   :  { %v2041_v25 = vmul.f32 %v3439_v54, %v3439_v54  ;;  %3444 = vpow2.f32 %v2009_v20  ;;  %v3226_v62 = vpack.c.bf16 %v2250_v41, %v2249_v56  ;;  %v3230_v4 = vpack.c.bf16 %v2252_v59, %v2251_v2  ;;  %v2253_v54 = vld [vmem:[%s4645_s10 + $0x70] sm:$0xff] }
 0x97e   :  { %v2441_v58 = vadd.f32 -1.0, %v2064_v31  ;;  %v2033_v8 = vadd.f32 %v2025_v21, %v1957_v30  ;;  %v2245_v30 = vld [vmem:[%s4645_s10 + $0x30] sm:$0xff] }
 0x97f   :  { %v2057_v33 = vadd.f32 %v2049_v23, %v2041_v25  ;;  %v3441_v29 = vpop.eup %3440  ;;  %v2254_v23 = vld [vmem:[%s4645_s10 + $0x78] sm:$0xff] }
 0x980   :  { %2081 = vadd.xlane.f32.xlu0 %v2441_v58  ;;  %2601 = vmatprep.mubr.f32.mxu0 %v2033_v8  ;;  %2369 = vst [vmem:[%s4648_s13 + $0x30] sm:$0xff] %v2033_v8  ;;  %v2026_v42 = vmul.f32 %v3441_v29, %v2018_v46  ;;  %v2042_v47 = vmul.f32 %v3441_v29, %v3441_v29 }
 0x981   :  { %v2065_v38 = vsub.f32 %v2057_v33, %v4444_v15 }
 0x982   :  { %v2034_v18 = vadd.f32 %v2026_v42, %v1963_v24  ;;  %v2058_v51 = vadd.f32 %v2050_v34, %v2042_v47  ;;  %v3234_v24 = vpack.c.bf16 %v2254_v23, %v2253_v54 }
 0x983   :  { %v2442_v48 = vadd.f32 -1.0, %v2065_v38  ;;  %v3443_v60 = vpop.eup %3442 }
 0x984   :  { %2602 = vmatmul.mubr.f32.gmra.mrb[26].mxu0 %v2034_v18  ;;  %2370 = vst [vmem:[%s4648_s13 + $0x48] sm:$0xff] %v2034_v18  ;;  %v2066_v15 = vsub.f32 %v2058_v51, %v4454_v14  ;;  %v2027_v45 = vmul.f32 %v3443_v60, %v2019_v16  ;;  %v2043_v5 = vmul.f32 %v3443_v60, %v3443_v60 }
 0x985   :  { %2083 = vadd.xlane.f32.xlu1 %v2442_v48 }
 0x986   :  { %v2443_v11 = vadd.f32 -1.0, %v2066_v15  ;;  %v2035_v19 = vadd.f32 %v2027_v45, %v1969_v35  ;;  %v2059_v9 = vadd.f32 %v2051_v61, %v2043_v5  ;;  %v4581_v45 = vld [vmem:[#allocation10] ss:$0 sm:$0xff] }
 0x987   :  { %v3445_v12 = vpop.eup %3444 }
 0x988   :  { %2604 = vmatprep.mubr.f32.mxu0 %v2035_v19  ;;  %2371 = vst [vmem:[%s4648_s13 + $0x60] sm:$0xff] %v2035_v19  ;;  %v2067_v36 = vsub.f32 %v2059_v9, %v4463_v39  ;;  %v2028_v14 = vmul.f32 %v3445_v12, %v2020_v10  ;;  %v2044_v28 = vmul.f32 %v3445_v12, %v3445_v12  ;;  %v2240_v39 = vld [vmem:[%s4645_s10 + $0x8] sm:$0xff] }
 0x989   :  { %2085 = vadd.xlane.f32.xlu1 %v2443_v11  ;;  %v3206_v6 = vpack.c.bf16 %v2240_v39, %v2239_v63 }
 0x98a   :  { %v2444_v52 = vadd.f32 -1.0, %v2067_v36  ;;  %v2036_v32 = vadd.f32 %v2028_v14, %v1975_v1  ;;  %v2060_v44 = vadd.f32 %v2052_v27, %v2044_v28  ;;  %v2021_v27 = vld [vmem:[%s4647_s12 + $0x30] sm:$0xff] }
 0x98b   :  { %3207 = vmatprep.subr.bf16.mxu1 %v3206_v6 }
 0x98c   :  { %2087 = vadd.xlane.f32.xlu0 %v2444_v52  ;;  %2605 = vmatmul.mubr.f32.gmra.mrb[28].mxu0 %v2036_v32  ;;  %2372 = vst [vmem:[%s4648_s13 + $0x78] sm:$0xff] %v2036_v32  ;;  %v2068_v50 = vsub.f32 %v2060_v44, %v4472_v17  ;;  %v3218_v17 = vpack.c.bf16 %v2246_v53, %v2245_v30 }
 0x98d   :  { %3209 = vmatpush3.bf16.msra.mxu1 %v3206_v6 }
 0x98e   :  { %v2445_v57 = vadd.f32 -1.0, %v2068_v50  ;;  %3211 = vmatprep.subr.bf16.mxu1 %v3210_v3  ;;  %v2022_v50 = vld [vmem:[%s4647_s12 + $0x38] sm:$0xff] }
 0x990   :  { %2089 = vadd.xlane.f32.xlu1 %v2445_v57 }
 0x991   :  { %3213 = vmatpush3.bf16.msra.mxu1 %v3210_v3 }
 0x992   :  { %3215 = vmatprep.subr.bf16.mxu1 %v3214_v43 }
 0x995   :  { %3217 = vmatpush3.bf16.msra.mxu1 %v3214_v43 }
 0x996   :  { %3219 = vmatprep.subr.bf16.mxu1 %v3218_v17 }
 0x999   :  { %3221 = vmatpush3.bf16.msra.mxu1 %v3218_v17 }
 0x99a   :  { %3223 = vmatprep.subr.bf16.mxu1 %v3222_v26 }
 0x99d   :  { %3225 = vmatpush3.bf16.msra.mxu1 %v3222_v26 }
 0x99e   :  { %3227 = vmatprep.subr.bf16.mxu1 %v3226_v62 }
 0x9a1   :  { %3229 = vmatpush3.bf16.msra.mxu1 %v3226_v62 }
 0x9a2   :  { %3231 = vmatprep.subr.bf16.mxu1 %v3230_v4 }
 0x9a5   :  { %3233 = vmatpush3.bf16.msra.mxu1 %v3230_v4 }
 0x9a6   :  { %3235 = vmatprep.subr.bf16.mxu1 %v3234_v24 }
 0x9a9   :  { %3237 = vmatpush3.bf16.msra.mxu1 %v3234_v24 }
 0xa09   :  { %v2080_v20 = vpop.xlane.xlu0 %2079 }
 0xa0a   :  { %v2095_v31 = vmul.f32 0.5, %v2080_v20 }
 0xa0c   :  { %2383 = vst [vmem:[%s4648_s13 + $0x10] sm:$0xff] %v2095_v31  ;;  %v2449_v31 = vld [vmem:[#allocation12] ss:$0 sm:$0xff] }
 0xa0d   :  { %v2082_v21 = vpop.xlane.xlu0 %2081 }
 0xa0e   :  { %v2096_v25 = vmul.f32 0.5, %v2082_v21 }
 0xa10   :  { %2384 = vst [vmem:[%s4648_s13 + $0x28] sm:$0xff] %v2096_v25 }
 0xa12   :  { %v2084_v46 = vpop.xlane.xlu1 %2083 }
 0xa13   :  { %v2097_v58 = vmul.f32 0.5, %v2084_v46 }
 0xa15   :  { %2385 = vst [vmem:[%s4648_s13 + $0x40] sm:$0xff] %v2097_v58 }
 0xa16   :  { %v2086_v8 = vpop.xlane.xlu1 %2085 }
 0xa17   :  { %v2098_v33 = vmul.f32 0.5, %v2086_v8 }
 0xa19   :  { %2386 = vst [vmem:[%s4648_s13 + $0x58] sm:$0xff] %v2098_v33  ;;  %v2088_v29 = vpop.xlane.xlu0 %2087 }
 0xa1a   :  { %v2099_v34 = vmul.f32 0.5, %v2088_v29 }
 0xa1c   :  { %2387 = vst [vmem:[%s4648_s13 + $0x70] sm:$0xff] %v2099_v34 }
 0xa1d   :  { %v2090_v35 = vpop.xlane.xlu1 %2089 }
 0xa1e   :  { %v2100_v38 = vmul.f32 0.5, %v2090_v35 }
 0xa20   :  { %2388 = vst [vmem:[%s4648_s13 + $0x88] sm:$0xff] %v2100_v38 }
 0xa43   :  { %v1980_v42 = vpop.f32.mrb[28].mxu1 }
 0xa44   :  { %v1982_v47 = vpop.f32.mrb[29].mxu1  ;;  %v1981_v9 = vadd.f32 %v1980_v42, %v4448_v55 }
 0xa45   :  { %v1983_v16 = vadd.f32 %v1982_v47, %v4436_v37 }
 0xa46   :  { %v2053_v14 = vmul.f32 %v1981_v9, %v1981_v9 }
 0xa47   :  { %v1997_v48 = vmul.f32 0.5, %v1983_v16  ;;  %v1986_v18 = vpop.f32.mrb[30].mxu1 }
 0xa48   :  { %v1988_v51 = vpop.f32.mrb[31].mxu1  ;;  %v1987_v28 = vadd.f32 %v1986_v18, %v4448_v55 }
 0xa49   :  { %v2011_v60 = vmul.f32 1.442695, %v1997_v48  ;;  %v1989_v61 = vadd.f32 %v1988_v51, %v4436_v37 }
 0xa4a   :  { %v2054_v3 = vmul.f32 %v1987_v28, %v1987_v28 }
 0xa4b   :  { %3446 = vpow2.f32 %v2011_v60  ;;  %v1998_v1 = vmul.f32 0.5, %v1989_v61 }
 0xa4d   :  { %v2013_v15 = vmul.f32 1.442695, %v1998_v1 }
 0xa4f   :  { %3448 = vpow2.f32 %v2013_v15  ;;  %v2600_v5 = vpop.f32.mrb[24].mxu0 }
 0xa50   :  { %v2198_v10 = vadd.f32 %v2600_v5, %v4581_v45  ;;  %v2192_v11 = vpop.f32.mrb[25].mxu0 }
 0xa51   :  { %v2193_v19 = vadd.f32 %v4581_v45, %v2192_v11 }
 0xa52   :  { %v2232_v37 = vmax.f32 %v2198_v10, 0.0 }
 0xa53   :  { %v2231_v12 = vmax.f32 %v2193_v19, 0.0 }
 0xa55   :  { %v3447_v36 = vpop.eup %3446  ;;  %2642 = vmatprep.mubr.f32.mxu1 %v2231_v12 }
 0xa56   :  { %2643 = vmatmul.mubr.f32.vlgmr.msra.gmra.mrb[32].mxu1 %v2232_v37  ;;  %v2029_v52 = vmul.f32 %v3447_v36, %v2021_v27  ;;  %v2045_v32 = vmul.f32 %v3447_v36, %v3447_v36 }
 0xa57   :  { %v2603_v44 = vpop.f32.mrb[26].mxu0 }
 0xa58   :  { %v2208_v57 = vadd.f32 %v2603_v44, %v4581_v45  ;;  %v2202_v63 = vpop.f32.mrb[27].mxu0  ;;  %v2037_v39 = vadd.f32 %v2029_v52, %v1981_v9  ;;  %v2061_v0 = vadd.f32 %v2053_v14, %v2045_v32 }
 0xa59   :  { %v3449_v6 = vpop.eup %3448  ;;  %v2203_v7 = vadd.f32 %v4581_v45, %v2202_v63 }
 0xa5a   :  { %2607 = vmatprep.mubr.f32.mxu0 %v2037_v39  ;;  %2373 = vst [vmem:[%s4648_s13 + $0x90] sm:$0xff] %v2037_v39  ;;  %v2069_v55 = vsub.f32 %v2061_v0, %v1983_v16  ;;  %v2030_v13 = vmul.f32 %v3449_v6, %v2022_v50  ;;  %v2046_v40 = vmul.f32 %v3449_v6, %v3449_v6  ;;  %v2234_v30 = vmax.f32 %v2208_v57, 0.0 }
 0xa5b   :  { %v2233_v43 = vmax.f32 %v2203_v7, 0.0 }
 0xa5c   :  { %v2446_v53 = vadd.f32 -1.0, %v2069_v55  ;;  %v2038_v17 = vadd.f32 %v2030_v13, %v1987_v28  ;;  %v2062_v49 = vadd.f32 %v2054_v3, %v2046_v40 }
 0xa5d   :  { %2645 = vmatprep.mubr.f32.mxu1 %v2233_v43 }
 0xa5e   :  { %2646 = vmatmul.mubr.f32.gmra.mrb[34].mxu1 %v2234_v30  ;;  %2091 = vadd.xlane.f32.xlu0 %v2446_v53  ;;  %2374 = vst [vmem:[%s4648_s13 + $0xa8] sm:$0xff] %v2038_v17  ;;  %v2070_v22 = vsub.f32 %v2062_v49, %v1989_v61 }
 0xa5f   :  { %v2606_v26 = vpop.f32.mrb[28].mxu0  ;;  %2608 = vmatmul.mubr.f32.gmra.mrb[30].mxu0 %v2038_v17 }
 0xa60   :  { %v2218_v56 = vadd.f32 %v2606_v26, %v4581_v45  ;;  %v2212_v41 = vpop.f32.mrb[29].mxu0  ;;  %v2447_v62 = vadd.f32 -1.0, %v2070_v22 }
 0xa61   :  { %v2213_v2 = vadd.f32 %v4581_v45, %v2212_v41 }
 0xa62   :  { %2093 = vadd.xlane.f32.xlu1 %v2447_v62  ;;  %v2236_v4 = vmax.f32 %v2218_v56, 0.0 }
 0xa63   :  { %v2235_v59 = vmax.f32 %v2213_v2, 0.0 }
 0xa65   :  { %2648 = vmatprep.mubr.f32.mxu1 %v2235_v59 }
 0xa66   :  { %2649 = vmatmul.mubr.f32.gmra.mrb[36].mxu1 %v2236_v4 }
 0xaeb   :  { %v2092_v54 = vpop.xlane.xlu0 %2091 }
 0xaec   :  { %v2101_v23 = vmul.f32 0.5, %v2092_v54 }
 0xaee   :  { %2389 = vst [vmem:[%s4648_s13 + $0xa0] sm:$0xff] %v2101_v23 }
 0xaef   :  { %v2094_v24 = vpop.xlane.xlu1 %2093 }
 0xaf0   :  { %v2102_v20 = vmul.f32 0.5, %v2094_v24 }
 0xaf2   :  { %2390 = vst [vmem:[%s4648_s13 + $0xb8] sm:$0xff] %v2102_v20 }
 0xb29   :  { %v2644_v21 = vpop.f32.mrb[32].mxu1 }
 0xb2a   :  { %v2334_v25 = vadd.f32 %v2644_v21, %v2449_v31  ;;  %v2328_v46 = vpop.f32.mrb[33].mxu1 }
 0xb2b   :  { %v2329_v58 = vadd.f32 %v2449_v31, %v2328_v46 }
 0xb2c   :  { %2376 = vst [vmem:[%s4648_s13 + $0x20] sm:$0xff] %v2334_v25 }
 0xb2d   :  { %2375 = vst [vmem:[%s4648_s13 + $0x8] sm:$0xff] %v2329_v58 }
 0xb31   :  { %v2647_v8 = vpop.f32.mrb[34].mxu1 }
 0xb32   :  { %v2344_v33 = vadd.f32 %v2647_v8, %v2449_v31  ;;  %v2609_v29 = vpop.f32.mrb[30].mxu0  ;;  %v2338_v34 = vpop.f32.mrb[35].mxu1 }
 0xb33   :  { %v2228_v35 = vadd.f32 %v2609_v29, %v4581_v45  ;;  %v2339_v38 = vadd.f32 %v2449_v31, %v2338_v34  ;;  %v2222_v42 = vpop.f32.mrb[31].mxu0 }
 0xb34   :  { %2378 = vst [vmem:[%s4648_s13 + $0x50] sm:$0xff] %v2344_v33  ;;  %v2223_v47 = vadd.f32 %v4581_v45, %v2222_v42 }
 0xb35   :  { %2377 = vst [vmem:[%s4648_s13 + $0x38] sm:$0xff] %v2339_v38  ;;  %v2238_v48 = vmax.f32 %v2228_v35, 0.0 }
 0xb36   :  { %v2237_v16 = vmax.f32 %v2223_v47, 0.0 }
 0xb38   :  { %2651 = vmatprep.mubr.f32.mxu1 %v2237_v16 }
 0xb39   :  { %v2650_v18 = vpop.f32.mrb[36].mxu1  ;;  %2652 = vmatmul.mubr.f32.gmra.mrb[38].mxu1 %v2238_v48 }
 0xb3a   :  { %v2354_v51 = vadd.f32 %v2650_v18, %v2449_v31  ;;  %v2348_v60 = vpop.f32.mrb[37].mxu1 }
 0xb3b   :  { %v2349_v61 = vadd.f32 %v2449_v31, %v2348_v60 }
 0xb3c   :  { %2380 = vst [vmem:[%s4648_s13 + $0x80] sm:$0xff] %v2354_v51 }
 0xb3d   :  { %2379 = vst [vmem:[%s4648_s13 + $0x68] sm:$0xff] %v2349_v61 }
 0xc0c   :  { %v2653_v1 = vpop.f32.mrb[38].mxu1 }
 0xc0d   :  { %v2364_v15 = vadd.f32 %v2653_v1, %v2449_v31  ;;  %v2358_v45 = vpop.f32.mrb[39].mxu1 }
 0xc0e   :  { %v2359_v5 = vadd.f32 %v2449_v31, %v2358_v45 }
 0xc0f   :  { %2382 = vst [vmem:[%s4648_s13 + $0xb0] sm:$0xff] %v2364_v15 }
 0xc10   :  { %2381 = vst [vmem:[%s4648_s13 + $0x98] sm:$0xff] %v2359_v5 }
 0xc11   :  { %2395 = vsyncpa [#allocation3], 1 }
 0xc12   :  { %2396 = vsyncpa [#allocation5], 1 }
 0xc13   :  { %2397 = vsyncpa [#allocation8], 1 }
 0xc14   :  { %2398 = vsyncpa [#allocation11], 1 }

</bundles_post_ra>
